<compile_context>
chip_gen: v7x
topology: tpu7x:2x2x1
jax: 0.10.0
libtpu: 0.0.40
codegen_flags: <defaults>
</compile_context>

<pallas_src>
import math
import numpy as np
import jax
import jax.numpy as jnp
from jax.experimental import pallas as pl
from jax.experimental.pallas import tpu as pltpu

# --- problem sizes (small, consistent with the module: word_vec=16, d_model=32, heads=4) ---
B, S = 2, 8
DVEC, DMODEL, HEADS = 16, 32, 4
DK = DMODEL // HEADS
DFF = 4 * DMODEL
EPS = 1e-6
INV_SQRT2 = 1.0 / math.sqrt(2.0)


# --------------------------------- Pallas kernel ---------------------------------
def plm_cs_kernel(x_ref, mask_ref, w0_ref, pe0_ref,
                  e1_wqkv_ref, e1_bqkv_ref, e1_wo_ref, e1_bo_ref,
                  e1_a1_ref, e1_c1_ref, e1_a2_ref, e1_c2_ref,
                  e1_w1_ref, e1_b1_ref, e1_w2_ref, e1_b2_ref,
                  e2_a1_ref, e2_c1_ref, e2_a2_ref, e2_c2_ref,
                  e2_wqkv_ref, e2_bqkv_ref, e2_wo_ref, e2_bo_ref,
                  e2_wf_ref, e2_bf_ref, e2_wp_ref, e2_bp_ref,
                  o_ref):
    x = x_ref[...]              # (B*S, DVEC)
    mask_bh = mask_ref[...]     # (B*HEADS, 1, S); 1 = keep, 0 = masked key position

    def layer_norm(z, alpha, bias):
        # matches torch Norm: alpha * (z - mean) / (std_unbiased + eps) + bias
        mu = jnp.mean(z, axis=-1, keepdims=True)
        zc = z - mu
        std = jnp.sqrt(jnp.sum(zc * zc, axis=-1, keepdims=True) * (1.0 / (DMODEL - 1)))
        return alpha * (zc / (std + EPS)) + bias

    def gelu(z):
        # exact-erf GELU (F.gelu default), erf via A&S 7.1.26 polynomial (|err| < 1.5e-7)
        u = z * INV_SQRT2
        au = jnp.abs(u)
        t = 1.0 / (1.0 + 0.3275911 * au)
        poly = ((((1.061405429 * t - 1.453152027) * t + 1.421413741) * t
                 - 0.284496736) * t + 0.254829592) * t
        erf_abs = 1.0 - poly * jnp.exp(-au * au)
        erf_u = jnp.where(u >= 0.0, erf_abs, -erf_abs)
        return 0.5 * z * (1.0 + erf_u)

    def mha(xn, wqkv, bqkv, wo, bo):
        # fused QKV projection: one MXU issue instead of three (wq/bq pre-scaled by 1/sqrt(DK))
        qkv = jnp.dot(xn, wqkv, preferred_element_type=jnp.float32)      # (B*S, 3*DMODEL)
        qkv = qkv + bqkv
        # split into (B*HEADS, S, DK) blocks so batches/heads stay independent,
        # then a single batched matmul for scores and one for P@V (no explicit k.T).
        q_blk, k_blk, v_blk = [], [], []
        for b in range(B):
            r0 = b * S
            for h in range(HEADS):
                c = h * DK
                q_blk.append(qkv[r0:r0 + S, c:c + DK])
                k_blk.append(qkv[r0:r0 + S, DMODEL + c:DMODEL + c + DK])
                v_blk.append(qkv[r0:r0 + S, 2 * DMODEL + c:2 * DMODEL + c + DK])
        qh = jnp.stack(q_blk, axis=0)                                     # (B*H, S, DK)
        kh = jnp.stack(k_blk, axis=0)
        vh = jnp.stack(v_blk, axis=0)
        sc = jnp.einsum("bqd,bkd->bqk", qh, kh,
                        preferred_element_type=jnp.float32)               # (B*H, S, S)
        sc = jnp.where(mask_bh == 0.0, -1e9, sc)                          # masked_fill(mask==0)
        sc = sc - jnp.max(sc, axis=-1, keepdims=True)
        p = jnp.exp(sc)
        p = p * pl.reciprocal(jnp.sum(p, axis=-1, keepdims=True), approx=True)
        pv = jnp.einsum("bqk,bkd->bqd", p, vh,
                        preferred_element_type=jnp.float32)               # (B*H, S, DK)
        rows = []
        for b in range(B):                                                # concat heads -> (S, DMODEL)
            rows.append(jnp.concatenate([pv[b * HEADS + h] for h in range(HEADS)], axis=-1))
        concat = jnp.concatenate(rows, axis=0)                            # (B*S, DMODEL)
        return jnp.dot(concat, wo, preferred_element_type=jnp.float32) + bo

    # read every norm parameter exactly once (hoist broadcasts out of all use sites)
    e1_a1, e1_c1 = e1_a1_ref[...], e1_c1_ref[...]
    e1_a2, e1_c2 = e1_a2_ref[...], e1_c2_ref[...]
    e2_a1, e2_c1 = e2_a1_ref[...], e2_c1_ref[...]
    e2_a2, e2_c2 = e2_a2_ref[...], e2_c2_ref[...]

    # --------------------------- Encoder1 ---------------------------
    # Linear0 + PositionalEncoder: w0 and pe0 already carry the sqrt(d_model) scale and b0.
    h = jnp.dot(x, w0_ref[...], preferred_element_type=jnp.float32) + pe0_ref[...]
    x2 = layer_norm(h, e1_a1, e1_c1)
    h = h + mha(x2, e1_wqkv_ref[...], e1_bqkv_ref[...], e1_wo_ref[...], e1_bo_ref[...])
    x2 = layer_norm(h, e1_a2, e1_c2)
    f = gelu(jnp.dot(x2, e1_w1_ref[...], preferred_element_type=jnp.float32) + e1_b1_ref[...])
    h = h + (jnp.dot(f, e1_w2_ref[...], preferred_element_type=jnp.float32) + e1_b2_ref[...])

    # --------------------------- Encoder2 ---------------------------
    x2 = layer_norm(h, e2_a1, e2_c1)
    h = h + mha(x2, e2_wqkv_ref[...], e2_bqkv_ref[...], e2_wo_ref[...], e2_bo_ref[...])
    h = layer_norm(h, e2_a2, e2_c2)          # Encoder2 replaces x with norm_2(x) (no residual)
    g = gelu(jnp.dot(h, e2_wf_ref[...], preferred_element_type=jnp.float32) + e2_bf_ref[...])
    o_ref[...] = jnp.dot(g, e2_wp_ref[...], preferred_element_type=jnp.float32) + e2_bp_ref[...]


# ------------------------- host-side parameter packing / wrapper -------------------------
def pack_params(P):
    """Fold sqrt(d_model) into Linear0/pe, fold 1/sqrt(d_k) into the Q projection,
    and fuse Q|K|V weights into a single (d_model, 3*d_model) matmul operand."""
    s = math.sqrt(DMODEL)
    inv_dk = 1.0 / math.sqrt(DK)
    K = {}
    K["w0"] = P["e1_w0"] * s
    K["pe0"] = jnp.tile(P["pe"], (B, 1)) + P["e1_b0"] * s                # (B*S, DMODEL)
    for e in ("e1", "e2"):
        K[e + "_wqkv"] = jnp.concatenate(
            [P[e + "_wq"] * inv_dk, P[e + "_wk"], P[e + "_wv"]], axis=1)
        K[e + "_bqkv"] = jnp.concatenate(
            [P[e + "_bq"] * inv_dk, P[e + "_bk"], P[e + "_bv"]], axis=1)
        for name in ("wo", "bo", "a1", "c1", "a2", "c2"):
            K[e + "_" + name] = P[e + "_" + name]
    for name in ("w1", "b1", "w2", "b2"):
        K["e1_" + name] = P["e1_" + name]
    for name in ("wf", "bf", "wp", "bp"):
        K["e2_" + name] = P["e2_" + name]
    return K


def plm_cs_forward(x, mask, P):
    """x: (B, S, DVEC), mask: (B, S) with 1=keep / 0=masked key."""
    K = pack_params(P)
    # expand mask to one row per (batch, head) block: (B*HEADS, 1, S)
    mask_bh = jnp.repeat(mask.astype(jnp.float32)[:, None, :], HEADS, axis=0)
    args = (
        x.reshape(B * S, DVEC), mask_bh, K["w0"], K["pe0"],
        K["e1_wqkv"], K["e1_bqkv"], K["e1_wo"], K["e1_bo"],
        K["e1_a1"], K["e1_c1"], K["e1_a2"], K["e1_c2"],
        K["e1_w1"], K["e1_b1"], K["e1_w2"], K["e1_b2"],
        K["e2_a1"], K["e2_c1"], K["e2_a2"], K["e2_c2"],
        K["e2_wqkv"], K["e2_bqkv"], K["e2_wo"], K["e2_bo"],
        K["e2_wf"], K["e2_bf"], K["e2_wp"], K["e2_bp"],
    )
    vmem = pl.BlockSpec(memory_space=pltpu.MemorySpace.VMEM)   # whole array resident in VMEM
    out = pl.pallas_call(
        plm_cs_kernel,
        out_shape=jax.ShapeDtypeStruct((B * S, 1), jnp.float32),
        in_specs=[vmem] * len(args),
        out_specs=vmem,
    )(*args)
    return out.reshape(B, S, 1)


# ------------------------- deterministic parameter construction -------------------------
def init_linear(key, fan_in, fan_out):
    k1, k2 = jax.random.split(key)
    bound = 1.0 / math.sqrt(fan_in)
    w = jax.random.uniform(k1, (fan_in, fan_out), jnp.float32, -bound, bound)
    b = jax.random.uniform(k2, (1, fan_out), jnp.float32, -bound, bound)
    return w, b


def build_pe(seq_len, d_model):
    # reproduce the PyTorch PositionalEncoder buffer exactly
    pe = np.zeros((seq_len, d_model), np.float32)
    for pos in range(seq_len):
        for i in range(0, d_model, 2):
            pe[pos, i] = math.sin(pos / 10000 ** (2 * i / d_model))
            pe[pos, i + 1] = math.cos(pos / 10000 ** (2 * (i + 1) / d_model))
    return jnp.asarray(pe)


def init_params(key):
    ks = jax.random.split(key, 13)
    P = {}
    # Encoder1
    P["e1_w0"], P["e1_b0"] = init_linear(ks[0], DVEC, DMODEL)
    P["e1_wq"], P["e1_bq"] = init_linear(ks[1], DMODEL, DMODEL)
    P["e1_wk"], P["e1_bk"] = init_linear(ks[2], DMODEL, DMODEL)
    P["e1_wv"], P["e1_bv"] = init_linear(ks[3], DMODEL, DMODEL)
    P["e1_wo"], P["e1_bo"] = init_linear(ks[4], DMODEL, DMODEL)
    P["e1_w1"], P["e1_b1"] = init_linear(ks[5], DMODEL, DFF)
    P["e1_w2"], P["e1_b2"] = init_linear(ks[6], DFF, DMODEL)
    P["e1_a1"] = jnp.ones((1, DMODEL), jnp.float32); P["e1_c1"] = jnp.zeros((1, DMODEL), jnp.float32)
    P["e1_a2"] = jnp.ones((1, DMODEL), jnp.float32); P["e1_c2"] = jnp.zeros((1, DMODEL), jnp.float32)
    # Encoder2
    P["e2_wq"], P["e2_bq"] = init_linear(ks[7], DMODEL, DMODEL)
    P["e2_wk"], P["e2_bk"] = init_linear(ks[8], DMODEL, DMODEL)
    P["e2_wv"], P["e2_bv"] = init_linear(ks[9], DMODEL, DMODEL)
    P["e2_wo"], P["e2_bo"] = init_linear(ks[10], DMODEL, DMODEL)
    P["e2_wf"], P["e2_bf"] = init_linear(ks[11], DMODEL, DFF)
    P["e2_wp"], P["e2_bp"] = init_linear(ks[12], DFF, 1)
    P["e2_a1"] = jnp.ones((1, DMODEL), jnp.float32); P["e2_c1"] = jnp.zeros((1, DMODEL), jnp.float32)
    P["e2_a2"] = jnp.ones((1, DMODEL), jnp.float32); P["e2_c2"] = jnp.zeros((1, DMODEL), jnp.float32)
    P["pe"] = build_pe(S, DMODEL)
    return P


# ---------------- pure-JAX reference (mirrors the PyTorch PLM_CS forward, eval mode) ----------------
def reference(x, mask, P):
    def norm(z, a, c):
        mu = z.mean(-1, keepdims=True)
        std = jnp.sqrt(((z - mu) ** 2).sum(-1, keepdims=True) / (DMODEL - 1))
        return a * (z - mu) / (std + EPS) + c

    def gelu(z):
        return 0.5 * z * (1.0 + jax.scipy.special.erf(z / math.sqrt(2.0)))

    def mha(xn, p):
        q = (xn @ P[p + "wq"] + P[p + "bq"]).reshape(B, S, HEADS, DK).transpose(0, 2, 1, 3)
        k = (xn @ P[p + "wk"] + P[p + "bk"]).reshape(B, S, HEADS, DK).transpose(0, 2, 1, 3)
        v = (xn @ P[p + "wv"] + P[p + "bv"]).reshape(B, S, HEADS, DK).transpose(0, 2, 1, 3)
        sc = jnp.einsum("bhqd,bhkd->bhqk", q, k) / math.sqrt(DK)
        sc = jnp.where(mask[:, None, None, :] == 0, -1e9, sc)
        pr = jax.nn.softmax(sc, axis=-1)
        o = jnp.einsum("bhqk,bhkd->bhqd", pr, v).transpose(0, 2, 1, 3).reshape(B, S, DMODEL)
        return o @ P[p + "wo"] + P[p + "bo"]

    # Encoder1
    h = x @ P["e1_w0"] + P["e1_b0"]
    h = h * math.sqrt(DMODEL) + P["pe"][None]
    x2 = norm(h, P["e1_a1"], P["e1_c1"])
    h = h + mha(x2, "e1_")
    x2 = norm(h, P["e1_a2"], P["e1_c2"])
    f = gelu(x2 @ P["e1_w1"] + P["e1_b1"])
    h = h + (f @ P["e1_w2"] + P["e1_b2"])
    # Encoder2
    x2 = norm(h, P["e2_a1"], P["e2_c1"])
    h = h + mha(x2, "e2_")
    h = norm(h, P["e2_a2"], P["e2_c2"])
    g = gelu(h @ P["e2_wf"] + P["e2_bf"])
    return g @ P["e2_wp"] + P["e2_bp"]         # (B, S, 1)


if __name__ == "__main__":
    key = jax.random.PRNGKey(0)
    kx, kp = jax.random.split(key)
    x = jax.random.normal(kx, (B, S, DVEC), jnp.float32)
    mask_np = np.ones((B, S), np.float32)
    mask_np[1, -3:] = 0.0                      # mask out the last 3 key positions of batch element 1
    mask = jnp.asarray(mask_np)
    P = init_params(kp)

    out = jax.block_until_ready(plm_cs_forward(x, mask, P))
    ref = reference(x, mask, P)

    assert out.shape == (B, S, 1)
    assert bool(jnp.all(jnp.isfinite(out)))
    np.testing.assert_allclose(np.asarray(out), np.asarray(ref), rtol=1e-2, atol=1e-2)
    print("KERNEL_OK")
</pallas_src>

<mosaic_0001>
module attributes {stable_mosaic.version = 11 : i64} {
  func.func @plm_cs_kernel(%arg0: memref<16x16xf32, #tpu.memory_space<vmem>>, %arg1: memref<8x1x8xf32, #tpu.memory_space<vmem>>, %arg2: memref<16x32xf32, #tpu.memory_space<vmem>>, %arg3: memref<16x32xf32, #tpu.memory_space<vmem>>, %arg4: memref<32x96xf32, #tpu.memory_space<vmem>>, %arg5: memref<1x96xf32, #tpu.memory_space<vmem>>, %arg6: memref<32x32xf32, #tpu.memory_space<vmem>>, %arg7: memref<1x32xf32, #tpu.memory_space<vmem>>, %arg8: memref<1x32xf32, #tpu.memory_space<vmem>>, %arg9: memref<1x32xf32, #tpu.memory_space<vmem>>, %arg10: memref<1x32xf32, #tpu.memory_space<vmem>>, %arg11: memref<1x32xf32, #tpu.memory_space<vmem>>, %arg12: memref<32x128xf32, #tpu.memory_space<vmem>>, %arg13: memref<1x128xf32, #tpu.memory_space<vmem>>, %arg14: memref<128x32xf32, #tpu.memory_space<vmem>>, %arg15: memref<1x32xf32, #tpu.memory_space<vmem>>, %arg16: memref<1x32xf32, #tpu.memory_space<vmem>>, %arg17: memref<1x32xf32, #tpu.memory_space<vmem>>, %arg18: memref<1x32xf32, #tpu.memory_space<vmem>>, %arg19: memref<1x32xf32, #tpu.memory_space<vmem>>, %arg20: memref<32x96xf32, #tpu.memory_space<vmem>>, %arg21: memref<1x96xf32, #tpu.memory_space<vmem>>, %arg22: memref<32x32xf32, #tpu.memory_space<vmem>>, %arg23: memref<1x32xf32, #tpu.memory_space<vmem>>, %arg24: memref<32x128xf32, #tpu.memory_space<vmem>>, %arg25: memref<1x128xf32, #tpu.memory_space<vmem>>, %arg26: memref<128x1xf32, #tpu.memory_space<vmem>>, %arg27: memref<1x1xf32, #tpu.memory_space<vmem>>, %arg28: memref<16x1xf32, #tpu.memory_space<vmem>>) attributes {dimension_semantics = [], scalar_prefetch = 0 : i64, scratch_operands = 0 : i64, tpu.core_type = #tpu.core_type<tc>} {
    %c0 = arith.constant 0 : index
    %c0_0 = arith.constant 0 : index
    %0 = vector.load %arg0[%c0, %c0_0] : memref<16x16xf32, #tpu.memory_space<vmem>>, vector<16x16xf32>
    %c0_1 = arith.constant 0 : index
    %c0_2 = arith.constant 0 : index
    %c0_3 = arith.constant 0 : index
    %1 = vector.load %arg1[%c0_1, %c0_2, %c0_3] : memref<8x1x8xf32, #tpu.memory_space<vmem>>, vector<8x1x8xf32>
    %c0_4 = arith.constant 0 : index
    %c0_5 = arith.constant 0 : index
    %2 = vector.load %arg8[%c0_4, %c0_5] : memref<1x32xf32, #tpu.memory_space<vmem>>, vector<1x32xf32>
    %c0_6 = arith.constant 0 : index
    %c0_7 = arith.constant 0 : index
    %3 = vector.load %arg9[%c0_6, %c0_7] : memref<1x32xf32, #tpu.memory_space<vmem>>, vector<1x32xf32>
    %c0_8 = arith.constant 0 : index
    %c0_9 = arith.constant 0 : index
    %4 = vector.load %arg10[%c0_8, %c0_9] : memref<1x32xf32, #tpu.memory_space<vmem>>, vector<1x32xf32>
    %c0_10 = arith.constant 0 : index
    %c0_11 = arith.constant 0 : index
    %5 = vector.load %arg11[%c0_10, %c0_11] : memref<1x32xf32, #tpu.memory_space<vmem>>, vector<1x32xf32>
    %c0_12 = arith.constant 0 : index
    %c0_13 = arith.constant 0 : index
    %6 = vector.load %arg16[%c0_12, %c0_13] : memref<1x32xf32, #tpu.memory_space<vmem>>, vector<1x32xf32>
    %c0_14 = arith.constant 0 : index
    %c0_15 = arith.constant 0 : index
    %7 = vector.load %arg17[%c0_14, %c0_15] : memref<1x32xf32, #tpu.memory_space<vmem>>, vector<1x32xf32>
    %c0_16 = arith.constant 0 : index
    %c0_17 = arith.constant 0 : index
    %8 = vector.load %arg18[%c0_16, %c0_17] : memref<1x32xf32, #tpu.memory_space<vmem>>, vector<1x32xf32>
    %c0_18 = arith.constant 0 : index
    %c0_19 = arith.constant 0 : index
    %9 = vector.load %arg19[%c0_18, %c0_19] : memref<1x32xf32, #tpu.memory_space<vmem>>, vector<1x32xf32>
    %c0_20 = arith.constant 0 : index
    %c0_21 = arith.constant 0 : index
    %10 = vector.load %arg2[%c0_20, %c0_21] : memref<16x32xf32, #tpu.memory_space<vmem>>, vector<16x32xf32>
    %cst = arith.constant dense<0.000000e+00> : vector<16x32xf32>
    %11 = tpu.matmul %0, %10, %cst {dimension_numbers = #tpu.dot_dimension_numbers<[1], [0], [0], [1], [0, 0, 1, 1], [], []>} : vector<16x16xf32>, vector<16x32xf32>, vector<16x32xf32> -> vector<16x32xf32>
    %c0_22 = arith.constant 0 : index
    %c0_23 = arith.constant 0 : index
    %12 = vector.load %arg3[%c0_22, %c0_23] : memref<16x32xf32, #tpu.memory_space<vmem>>, vector<16x32xf32>
    %13 = arith.addf %11, %12 : vector<16x32xf32>
    %cst_24 = arith.constant dense<0.000000e+00> : vector<16xf32>
    %14 = vector.multi_reduction <add>, %13, %cst_24 [1] : vector<16x32xf32> to vector<16xf32>
    %15 = vector.shape_cast %14 : vector<16xf32> to vector<16x1xf32>
    %cst_25 = arith.constant 3.200000e+01 : f32
    %16 = vector.broadcast %cst_25 : f32 to vector<16x1xf32>
    %17 = arith.divf %15, %16 : vector<16x1xf32>
    %18 = vector.broadcast %17 : vector<16x1xf32> to vector<16x32xf32>
    %19 = arith.subf %13, %18 : vector<16x32xf32>
    %20 = arith.mulf %19, %19 : vector<16x32xf32>
    %cst_26 = arith.constant dense<0.000000e+00> : vector<16xf32>
    %21 = vector.multi_reduction <add>, %20, %cst_26 [1] : vector<16x32xf32> to vector<16xf32>
    %22 = vector.shape_cast %21 : vector<16xf32> to vector<16x1xf32>
    %cst_27 = arith.constant 0.0322580636 : f32
    %23 = vector.broadcast %cst_27 : f32 to vector<16x1xf32>
    %24 = arith.mulf %22, %23 : vector<16x1xf32>
    %25 = math.sqrt %24 : vector<16x1xf32>
    %cst_28 = arith.constant 9.99999997E-7 : f32
    %26 = vector.broadcast %cst_28 : f32 to vector<16x1xf32>
    %27 = arith.addf %25, %26 : vector<16x1xf32>
    %28 = vector.broadcast %27 : vector<16x1xf32> to vector<16x32xf32>
    %29 = arith.divf %19, %28 : vector<16x32xf32>
    %30 = vector.broadcast %2 : vector<1x32xf32> to vector<16x32xf32>
    %31 = arith.mulf %30, %29 : vector<16x32xf32>
    %32 = vector.broadcast %3 : vector<1x32xf32> to vector<16x32xf32>
    %33 = arith.addf %31, %32 : vector<16x32xf32>
    %c0_29 = arith.constant 0 : index
    %c0_30 = arith.constant 0 : index
    %34 = vector.load %arg4[%c0_29, %c0_30] : memref<32x96xf32, #tpu.memory_space<vmem>>, vector<32x96xf32>
    %c0_31 = arith.constant 0 : index
    %c0_32 = arith.constant 0 : index
    %35 = vector.load %arg5[%c0_31, %c0_32] : memref<1x96xf32, #tpu.memory_space<vmem>>, vector<1x96xf32>
    %c0_33 = arith.constant 0 : index
    %c0_34 = arith.constant 0 : index
    %36 = vector.load %arg6[%c0_33, %c0_34] : memref<32x32xf32, #tpu.memory_space<vmem>>, vector<32x32xf32>
    %c0_35 = arith.constant 0 : index
    %c0_36 = arith.constant 0 : index
    %37 = vector.load %arg7[%c0_35, %c0_36] : memref<1x32xf32, #tpu.memory_space<vmem>>, vector<1x32xf32>
    %cst_37 = arith.constant dense<0.000000e+00> : vector<16x96xf32>
    %38 = tpu.matmul %33, %34, %cst_37 {dimension_numbers = #tpu.dot_dimension_numbers<[1], [0], [0], [1], [0, 0, 1, 1], [], []>} : vector<16x32xf32>, vector<32x96xf32>, vector<16x96xf32> -> vector<16x96xf32>
    %39 = vector.broadcast %35 : vector<1x96xf32> to vector<16x96xf32>
    %40 = arith.addf %38, %39 : vector<16x96xf32>
    %41 = vector.extract_strided_slice %40 {offsets = [0, 0], sizes = [8, 8], strides = [1, 1]} : vector<16x96xf32> to vector<8x8xf32>
    %42 = vector.extract_strided_slice %40 {offsets = [0, 32], sizes = [8, 8], strides = [1, 1]} : vector<16x96xf32> to vector<8x8xf32>
    %43 = vector.extract_strided_slice %40 {offsets = [0, 64], sizes = [8, 8], strides = [1, 1]} : vector<16x96xf32> to vector<8x8xf32>
    %44 = vector.extract_strided_slice %40 {offsets = [0, 8], sizes = [8, 8], strides = [1, 1]} : vector<16x96xf32> to vector<8x8xf32>
    %45 = vector.extract_strided_slice %40 {offsets = [0, 40], sizes = [8, 8], strides = [1, 1]} : vector<16x96xf32> to vector<8x8xf32>
    %46 = vector.extract_strided_slice %40 {offsets = [0, 72], sizes = [8, 8], strides = [1, 1]} : vector<16x96xf32> to vector<8x8xf32>
    %47 = vector.extract_strided_slice %40 {offsets = [0, 16], sizes = [8, 8], strides = [1, 1]} : vector<16x96xf32> to vector<8x8xf32>
    %48 = vector.extract_strided_slice %40 {offsets = [0, 48], sizes = [8, 8], strides = [1, 1]} : vector<16x96xf32> to vector<8x8xf32>
    %49 = vector.extract_strided_slice %40 {offsets = [0, 80], sizes = [8, 8], strides = [1, 1]} : vector<16x96xf32> to vector<8x8xf32>
    %50 = vector.extract_strided_slice %40 {offsets = [0, 24], sizes = [8, 8], strides = [1, 1]} : vector<16x96xf32> to vector<8x8xf32>
    %51 = vector.extract_strided_slice %40 {offsets = [0, 56], sizes = [8, 8], strides = [1, 1]} : vector<16x96xf32> to vector<8x8xf32>
    %52 = vector.extract_strided_slice %40 {offsets = [0, 88], sizes = [8, 8], strides = [1, 1]} : vector<16x96xf32> to vector<8x8xf32>
    %53 = vector.extract_strided_slice %40 {offsets = [8, 0], sizes = [8, 8], strides = [1, 1]} : vector<16x96xf32> to vector<8x8xf32>
    %54 = vector.extract_strided_slice %40 {offsets = [8, 32], sizes = [8, 8], strides = [1, 1]} : vector<16x96xf32> to vector<8x8xf32>
    %55 = vector.extract_strided_slice %40 {offsets = [8, 64], sizes = [8, 8], strides = [1, 1]} : vector<16x96xf32> to vector<8x8xf32>
    %56 = vector.extract_strided_slice %40 {offsets = [8, 8], sizes = [8, 8], strides = [1, 1]} : vector<16x96xf32> to vector<8x8xf32>
    %57 = vector.extract_strided_slice %40 {offsets = [8, 40], sizes = [8, 8], strides = [1, 1]} : vector<16x96xf32> to vector<8x8xf32>
    %58 = vector.extract_strided_slice %40 {offsets = [8, 72], sizes = [8, 8], strides = [1, 1]} : vector<16x96xf32> to vector<8x8xf32>
    %59 = vector.extract_strided_slice %40 {offsets = [8, 16], sizes = [8, 8], strides = [1, 1]} : vector<16x96xf32> to vector<8x8xf32>
    %60 = vector.extract_strided_slice %40 {offsets = [8, 48], sizes = [8, 8], strides = [1, 1]} : vector<16x96xf32> to vector<8x8xf32>
    %61 = vector.extract_strided_slice %40 {offsets = [8, 80], sizes = [8, 8], strides = [1, 1]} : vector<16x96xf32> to vector<8x8xf32>
    %62 = vector.extract_strided_slice %40 {offsets = [8, 24], sizes = [8, 8], strides = [1, 1]} : vector<16x96xf32> to vector<8x8xf32>
    %63 = vector.extract_strided_slice %40 {offsets = [8, 56], sizes = [8, 8], strides = [1, 1]} : vector<16x96xf32> to vector<8x8xf32>
    %64 = vector.extract_strided_slice %40 {offsets = [8, 88], sizes = [8, 8], strides = [1, 1]} : vector<16x96xf32> to vector<8x8xf32>
    %65 = vector.shape_cast %41 : vector<8x8xf32> to vector<1x8x8xf32>
    %66 = vector.shape_cast %44 : vector<8x8xf32> to vector<1x8x8xf32>
    %67 = vector.shape_cast %47 : vector<8x8xf32> to vector<1x8x8xf32>
    %68 = vector.shape_cast %50 : vector<8x8xf32> to vector<1x8x8xf32>
    %69 = vector.shape_cast %53 : vector<8x8xf32> to vector<1x8x8xf32>
    %70 = vector.shape_cast %56 : vector<8x8xf32> to vector<1x8x8xf32>
    %71 = vector.shape_cast %59 : vector<8x8xf32> to vector<1x8x8xf32>
    %72 = vector.shape_cast %62 : vector<8x8xf32> to vector<1x8x8xf32>
    %73 = tpu.concatenate %65, %66, %67, %68, %69, %70, %71, %72 in 0 : vector<1x8x8xf32>, vector<1x8x8xf32>, vector<1x8x8xf32>, vector<1x8x8xf32>, vector<1x8x8xf32>, vector<1x8x8xf32>, vector<1x8x8xf32>, vector<1x8x8xf32> -> vector<8x8x8xf32>
    %74 = vector.shape_cast %42 : vector<8x8xf32> to vector<1x8x8xf32>
    %75 = vector.shape_cast %45 : vector<8x8xf32> to vector<1x8x8xf32>
    %76 = vector.shape_cast %48 : vector<8x8xf32> to vector<1x8x8xf32>
    %77 = vector.shape_cast %51 : vector<8x8xf32> to vector<1x8x8xf32>
    %78 = vector.shape_cast %54 : vector<8x8xf32> to vector<1x8x8xf32>
    %79 = vector.shape_cast %57 : vector<8x8xf32> to vector<1x8x8xf32>
    %80 = vector.shape_cast %60 : vector<8x8xf32> to vector<1x8x8xf32>
    %81 = vector.shape_cast %63 : vector<8x8xf32> to vector<1x8x8xf32>
    %82 = tpu.concatenate %74, %75, %76, %77, %78, %79, %80, %81 in 0 : vector<1x8x8xf32>, vector<1x8x8xf32>, vector<1x8x8xf32>, vector<1x8x8xf32>, vector<1x8x8xf32>, vector<1x8x8xf32>, vector<1x8x8xf32>, vector<1x8x8xf32> -> vector<8x8x8xf32>
    %83 = vector.shape_cast %43 : vector<8x8xf32> to vector<1x8x8xf32>
    %84 = vector.shape_cast %46 : vector<8x8xf32> to vector<1x8x8xf32>
    %85 = vector.shape_cast %49 : vector<8x8xf32> to vector<1x8x8xf32>
    %86 = vector.shape_cast %52 : vector<8x8xf32> to vector<1x8x8xf32>
    %87 = vector.shape_cast %55 : vector<8x8xf32> to vector<1x8x8xf32>
    %88 = vector.shape_cast %58 : vector<8x8xf32> to vector<1x8x8xf32>
    %89 = vector.shape_cast %61 : vector<8x8xf32> to vector<1x8x8xf32>
    %90 = vector.shape_cast %64 : vector<8x8xf32> to vector<1x8x8xf32>
    %91 = tpu.concatenate %83, %84, %85, %86, %87, %88, %89, %90 in 0 : vector<1x8x8xf32>, vector<1x8x8xf32>, vector<1x8x8xf32>, vector<1x8x8xf32>, vector<1x8x8xf32>, vector<1x8x8xf32>, vector<1x8x8xf32>, vector<1x8x8xf32> -> vector<8x8x8xf32>
    "tpu.trace_start"() <{level = 10 : i32, message = "bqd,bkd->bqk"}> : () -> ()
    %cst_38 = arith.constant dense<0.000000e+00> : vector<8x8x8xf32>
    %92 = tpu.matmul %73, %82, %cst_38 {dimension_numbers = #tpu.dot_dimension_numbers<[2], [2], [1], [1], [0, 0, 0, 1, 1, 1], [0], [0]>} : vector<8x8x8xf32>, vector<8x8x8xf32>, vector<8x8x8xf32> -> vector<8x8x8xf32>
    %cst_39 = arith.constant 0.000000e+00 : f32
    "tpu.trace_stop"() : () -> ()
    %93 = vector.broadcast %cst_39 : f32 to vector<8x1x8xf32>
    %94 = arith.cmpf oeq, %1, %93 : vector<8x1x8xf32>
    %cst_40 = arith.constant -1.000000e+09 : f32
    %95 = vector.shape_cast %94 : vector<8x1x8xi1> to vector<8x1x8xi1>
    %96 = vector.broadcast %95 : vector<8x1x8xi1> to vector<8x8x8xi1>
    %97 = vector.broadcast %cst_40 : f32 to vector<8x8x8xf32>
    %98 = arith.select %96, %97, %92 : vector<8x8x8xi1>, vector<8x8x8xf32>
    %cst_41 = arith.constant dense<0xFF800000> : vector<8x8xf32>
    %99 = vector.multi_reduction <maximumf>, %98, %cst_41 [2] : vector<8x8x8xf32> to vector<8x8xf32>
    %100 = vector.shape_cast %99 : vector<8x8xf32> to vector<8x8x1xf32>
    %101 = vector.broadcast %100 : vector<8x8x1xf32> to vector<8x8x8xf32>
    %102 = arith.subf %98, %101 : vector<8x8x8xf32>
    %103 = math.exp %102 : vector<8x8x8xf32>
    %cst_42 = arith.constant dense<0.000000e+00> : vector<8x8xf32>
    %104 = vector.multi_reduction <add>, %103, %cst_42 [2] : vector<8x8x8xf32> to vector<8x8xf32>
    %105 = vector.shape_cast %104 : vector<8x8xf32> to vector<8x8x1xf32>
    %106 = tpu.reciprocal %105 {approx = true} : vector<8x8x1xf32> -> vector<8x8x1xf32>
    %107 = vector.broadcast %106 : vector<8x8x1xf32> to vector<8x8x8xf32>
    %108 = arith.mulf %103, %107 : vector<8x8x8xf32>
    "tpu.trace_start"() <{level = 10 : i32, message = "bqk,bkd->bqd"}> : () -> ()
    %cst_43 = arith.constant dense<0.000000e+00> : vector<8x8x8xf32>
    %109 = tpu.matmul %108, %91, %cst_43 {dimension_numbers = #tpu.dot_dimension_numbers<[2], [1], [1], [2], [0, 0, 0, 1, 1, 2], [0], [0]>} : vector<8x8x8xf32>, vector<8x8x8xf32>, vector<8x8x8xf32> -> vector<8x8x8xf32>
    "tpu.trace_stop"() : () -> ()
    %110 = vector.extract_strided_slice %109 {offsets = [0, 0, 0], sizes = [1, 8, 8], strides = [1, 1, 1]} : vector<8x8x8xf32> to vector<1x8x8xf32>
    %111 = vector.shape_cast %110 : vector<1x8x8xf32> to vector<8x8xf32>
    %112 = vector.extract_strided_slice %109 {offsets = [1, 0, 0], sizes = [1, 8, 8], strides = [1, 1, 1]} : vector<8x8x8xf32> to vector<1x8x8xf32>
    %113 = vector.shape_cast %112 : vector<1x8x8xf32> to vector<8x8xf32>
    %114 = vector.extract_strided_slice %109 {offsets = [2, 0, 0], sizes = [1, 8, 8], strides = [1, 1, 1]} : vector<8x8x8xf32> to vector<1x8x8xf32>
    %115 = vector.shape_cast %114 : vector<1x8x8xf32> to vector<8x8xf32>
    %116 = vector.extract_strided_slice %109 {offsets = [3, 0, 0], sizes = [1, 8, 8], strides = [1, 1, 1]} : vector<8x8x8xf32> to vector<1x8x8xf32>
    %117 = vector.shape_cast %116 : vector<1x8x8xf32> to vector<8x8xf32>
    %118 = tpu.concatenate %111, %113, %115, %117 in 1 : vector<8x8xf32>, vector<8x8xf32>, vector<8x8xf32>, vector<8x8xf32> -> vector<8x32xf32>
    %119 = vector.extract_strided_slice %109 {offsets = [4, 0, 0], sizes = [1, 8, 8], strides = [1, 1, 1]} : vector<8x8x8xf32> to vector<1x8x8xf32>
    %120 = vector.shape_cast %119 : vector<1x8x8xf32> to vector<8x8xf32>
    %121 = vector.extract_strided_slice %109 {offsets = [5, 0, 0], sizes = [1, 8, 8], strides = [1, 1, 1]} : vector<8x8x8xf32> to vector<1x8x8xf32>
    %122 = vector.shape_cast %121 : vector<1x8x8xf32> to vector<8x8xf32>
    %123 = vector.extract_strided_slice %109 {offsets = [6, 0, 0], sizes = [1, 8, 8], strides = [1, 1, 1]} : vector<8x8x8xf32> to vector<1x8x8xf32>
    %124 = vector.shape_cast %123 : vector<1x8x8xf32> to vector<8x8xf32>
    %125 = vector.extract_strided_slice %109 {offsets = [7, 0, 0], sizes = [1, 8, 8], strides = [1, 1, 1]} : vector<8x8x8xf32> to vector<1x8x8xf32>
    %126 = vector.shape_cast %125 : vector<1x8x8xf32> to vector<8x8xf32>
    %127 = tpu.concatenate %120, %122, %124, %126 in 1 : vector<8x8xf32>, vector<8x8xf32>, vector<8x8xf32>, vector<8x8xf32> -> vector<8x32xf32>
    %128 = tpu.concatenate %118, %127 in 0 : vector<8x32xf32>, vector<8x32xf32> -> vector<16x32xf32>
    %cst_44 = arith.constant dense<0.000000e+00> : vector<16x32xf32>
    %129 = tpu.matmul %128, %36, %cst_44 {dimension_numbers = #tpu.dot_dimension_numbers<[1], [0], [0], [1], [0, 0, 1, 1], [], []>} : vector<16x32xf32>, vector<32x32xf32>, vector<16x32xf32> -> vector<16x32xf32>
    %130 = vector.broadcast %37 : vector<1x32xf32> to vector<16x32xf32>
    %131 = arith.addf %129, %130 : vector<16x32xf32>
    %132 = arith.addf %13, %131 : vector<16x32xf32>
    %cst_45 = arith.constant dense<0.000000e+00> : vector<16xf32>
    %133 = vector.multi_reduction <add>, %132, %cst_45 [1] : vector<16x32xf32> to vector<16xf32>
    %134 = vector.shape_cast %133 : vector<16xf32> to vector<16x1xf32>
    %cst_46 = arith.constant 3.200000e+01 : f32
    %135 = vector.broadcast %cst_46 : f32 to vector<16x1xf32>
    %136 = arith.divf %134, %135 : vector<16x1xf32>
    %137 = vector.broadcast %136 : vector<16x1xf32> to vector<16x32xf32>
    %138 = arith.subf %132, %137 : vector<16x32xf32>
    %139 = arith.mulf %138, %138 : vector<16x32xf32>
    %cst_47 = arith.constant dense<0.000000e+00> : vector<16xf32>
    %140 = vector.multi_reduction <add>, %139, %cst_47 [1] : vector<16x32xf32> to vector<16xf32>
    %141 = vector.shape_cast %140 : vector<16xf32> to vector<16x1xf32>
    %cst_48 = arith.constant 0.0322580636 : f32
    %142 = vector.broadcast %cst_48 : f32 to vector<16x1xf32>
    %143 = arith.mulf %141, %142 : vector<16x1xf32>
    %144 = math.sqrt %143 : vector<16x1xf32>
    %cst_49 = arith.constant 9.99999997E-7 : f32
    %145 = vector.broadcast %cst_49 : f32 to vector<16x1xf32>
    %146 = arith.addf %144, %145 : vector<16x1xf32>
    %147 = vector.broadcast %146 : vector<16x1xf32> to vector<16x32xf32>
    %148 = arith.divf %138, %147 : vector<16x32xf32>
    %149 = vector.broadcast %4 : vector<1x32xf32> to vector<16x32xf32>
    %150 = arith.mulf %149, %148 : vector<16x32xf32>
    %151 = vector.broadcast %5 : vector<1x32xf32> to vector<16x32xf32>
    %152 = arith.addf %150, %151 : vector<16x32xf32>
    %c0_50 = arith.constant 0 : index
    %c0_51 = arith.constant 0 : index
    %153 = vector.load %arg12[%c0_50, %c0_51] : memref<32x128xf32, #tpu.memory_space<vmem>>, vector<32x128xf32>
    %cst_52 = arith.constant dense<0.000000e+00> : vector<16x128xf32>
    %154 = tpu.matmul %152, %153, %cst_52 {dimension_numbers = #tpu.dot_dimension_numbers<[1], [0], [0], [1], [0, 0, 1, 1], [], []>} : vector<16x32xf32>, vector<32x128xf32>, vector<16x128xf32> -> vector<16x128xf32>
    %c0_53 = arith.constant 0 : index
    %c0_54 = arith.constant 0 : index
    %155 = vector.load %arg13[%c0_53, %c0_54] : memref<1x128xf32, #tpu.memory_space<vmem>>, vector<1x128xf32>
    %156 = vector.broadcast %155 : vector<1x128xf32> to vector<16x128xf32>
    %157 = arith.addf %154, %156 : vector<16x128xf32>
    %cst_55 = arith.constant 0.707106769 : f32
    %158 = vector.broadcast %cst_55 : f32 to vector<16x128xf32>
    %159 = arith.mulf %157, %158 : vector<16x128xf32>
    %160 = math.absf %159 : vector<16x128xf32>
    %cst_56 = arith.constant 0.327591091 : f32
    %161 = vector.broadcast %cst_56 : f32 to vector<16x128xf32>
    %162 = arith.mulf %161, %160 : vector<16x128xf32>
    %cst_57 = arith.constant 1.000000e+00 : f32
    %163 = vector.broadcast %cst_57 : f32 to vector<16x128xf32>
    %164 = arith.addf %163, %162 : vector<16x128xf32>
    %cst_58 = arith.constant 1.000000e+00 : f32
    %165 = vector.broadcast %cst_58 : f32 to vector<16x128xf32>
    %166 = arith.divf %165, %164 : vector<16x128xf32>
    %cst_59 = arith.constant 1.06140542 : f32
    %167 = vector.broadcast %cst_59 : f32 to vector<16x128xf32>
    %168 = arith.mulf %167, %166 : vector<16x128xf32>
    %cst_60 = arith.constant 1.45315206 : f32
    %169 = vector.broadcast %cst_60 : f32 to vector<16x128xf32>
    %170 = arith.subf %168, %169 : vector<16x128xf32>
    %171 = arith.mulf %170, %166 : vector<16x128xf32>
    %cst_61 = arith.constant 1.42141378 : f32
    %172 = vector.broadcast %cst_61 : f32 to vector<16x128xf32>
    %173 = arith.addf %171, %172 : vector<16x128xf32>
    %174 = arith.mulf %173, %166 : vector<16x128xf32>
    %cst_62 = arith.constant 0.284496725 : f32
    %175 = vector.broadcast %cst_62 : f32 to vector<16x128xf32>
    %176 = arith.subf %174, %175 : vector<16x128xf32>
    %177 = arith.mulf %176, %166 : vector<16x128xf32>
    %cst_63 = arith.constant 0.254829586 : f32
    %178 = vector.broadcast %cst_63 : f32 to vector<16x128xf32>
    %179 = arith.addf %177, %178 : vector<16x128xf32>
    %180 = arith.mulf %179, %166 : vector<16x128xf32>
    %cst_64 = arith.constant 0.000000e+00 : f32
    %181 = vector.broadcast %cst_64 : f32 to vector<16x128xf32>
    %182 = arith.subf %181, %160 : vector<16x128xf32>
    %183 = arith.mulf %182, %160 : vector<16x128xf32>
    %184 = math.exp %183 : vector<16x128xf32>
    %185 = arith.mulf %180, %184 : vector<16x128xf32>
    %cst_65 = arith.constant 1.000000e+00 : f32
    %186 = vector.broadcast %cst_65 : f32 to vector<16x128xf32>
    %187 = arith.subf %186, %185 : vector<16x128xf32>
    %cst_66 = arith.constant 0.000000e+00 : f32
    %188 = vector.broadcast %cst_66 : f32 to vector<16x128xf32>
    %189 = arith.cmpf oge, %159, %188 : vector<16x128xf32>
    %cst_67 = arith.constant 0.000000e+00 : f32
    %190 = vector.broadcast %cst_67 : f32 to vector<16x128xf32>
    %191 = arith.subf %190, %187 : vector<16x128xf32>
    %192 = arith.select %189, %187, %191 : vector<16x128xi1>, vector<16x128xf32>
    %cst_68 = arith.constant 5.000000e-01 : f32
    %193 = vector.broadcast %cst_68 : f32 to vector<16x128xf32>
    %194 = arith.mulf %193, %157 : vector<16x128xf32>
    %cst_69 = arith.constant 1.000000e+00 : f32
    %195 = vector.broadcast %cst_69 : f32 to vector<16x128xf32>
    %196 = arith.addf %195, %192 : vector<16x128xf32>
    %197 = arith.mulf %194, %196 : vector<16x128xf32>
    %c0_70 = arith.constant 0 : index
    %c0_71 = arith.constant 0 : index
    %198 = vector.load %arg14[%c0_70, %c0_71] : memref<128x32xf32, #tpu.memory_space<vmem>>, vector<128x32xf32>
    %cst_72 = arith.constant dense<0.000000e+00> : vector<16x32xf32>
    %199 = tpu.matmul %197, %198, %cst_72 {dimension_numbers = #tpu.dot_dimension_numbers<[1], [0], [0], [1], [0, 0, 1, 1], [], []>} : vector<16x128xf32>, vector<128x32xf32>, vector<16x32xf32> -> vector<16x32xf32>
    %c0_73 = arith.constant 0 : index
    %c0_74 = arith.constant 0 : index
    %200 = vector.load %arg15[%c0_73, %c0_74] : memref<1x32xf32, #tpu.memory_space<vmem>>, vector<1x32xf32>
    %201 = vector.broadcast %200 : vector<1x32xf32> to vector<16x32xf32>
    %202 = arith.addf %199, %201 : vector<16x32xf32>
    %203 = arith.addf %132, %202 : vector<16x32xf32>
    %cst_75 = arith.constant dense<0.000000e+00> : vector<16xf32>
    %204 = vector.multi_reduction <add>, %203, %cst_75 [1] : vector<16x32xf32> to vector<16xf32>
    %205 = vector.shape_cast %204 : vector<16xf32> to vector<16x1xf32>
    %cst_76 = arith.constant 3.200000e+01 : f32
    %206 = vector.broadcast %cst_76 : f32 to vector<16x1xf32>
    %207 = arith.divf %205, %206 : vector<16x1xf32>
    %208 = vector.broadcast %207 : vector<16x1xf32> to vector<16x32xf32>
    %209 = arith.subf %203, %208 : vector<16x32xf32>
    %210 = arith.mulf %209, %209 : vector<16x32xf32>
    %cst_77 = arith.constant dense<0.000000e+00> : vector<16xf32>
    %211 = vector.multi_reduction <add>, %210, %cst_77 [1] : vector<16x32xf32> to vector<16xf32>
    %212 = vector.shape_cast %211 : vector<16xf32> to vector<16x1xf32>
    %cst_78 = arith.constant 0.0322580636 : f32
    %213 = vector.broadcast %cst_78 : f32 to vector<16x1xf32>
    %214 = arith.mulf %212, %213 : vector<16x1xf32>
    %215 = math.sqrt %214 : vector<16x1xf32>
    %cst_79 = arith.constant 9.99999997E-7 : f32
    %216 = vector.broadcast %cst_79 : f32 to vector<16x1xf32>
    %217 = arith.addf %215, %216 : vector<16x1xf32>
    %218 = vector.broadcast %217 : vector<16x1xf32> to vector<16x32xf32>
    %219 = arith.divf %209, %218 : vector<16x32xf32>
    %220 = vector.broadcast %6 : vector<1x32xf32> to vector<16x32xf32>
    %221 = arith.mulf %220, %219 : vector<16x32xf32>
    %222 = vector.broadcast %7 : vector<1x32xf32> to vector<16x32xf32>
    %223 = arith.addf %221, %222 : vector<16x32xf32>
    %c0_80 = arith.constant 0 : index
    %c0_81 = arith.constant 0 : index
    %224 = vector.load %arg20[%c0_80, %c0_81] : memref<32x96xf32, #tpu.memory_space<vmem>>, vector<32x96xf32>
    %c0_82 = arith.constant 0 : index
    %c0_83 = arith.constant 0 : index
    %225 = vector.load %arg21[%c0_82, %c0_83] : memref<1x96xf32, #tpu.memory_space<vmem>>, vector<1x96xf32>
    %c0_84 = arith.constant 0 : index
    %c0_85 = arith.constant 0 : index
    %226 = vector.load %arg22[%c0_84, %c0_85] : memref<32x32xf32, #tpu.memory_space<vmem>>, vector<32x32xf32>
    %c0_86 = arith.constant 0 : index
    %c0_87 = arith.constant 0 : index
    %227 = vector.load %arg23[%c0_86, %c0_87] : memref<1x32xf32, #tpu.memory_space<vmem>>, vector<1x32xf32>
    %cst_88 = arith.constant dense<0.000000e+00> : vector<16x96xf32>
    %228 = tpu.matmul %223, %224, %cst_88 {dimension_numbers = #tpu.dot_dimension_numbers<[1], [0], [0], [1], [0, 0, 1, 1], [], []>} : vector<16x32xf32>, vector<32x96xf32>, vector<16x96xf32> -> vector<16x96xf32>
    %229 = vector.broadcast %225 : vector<1x96xf32> to vector<16x96xf32>
    %230 = arith.addf %228, %229 : vector<16x96xf32>
    %231 = vector.extract_strided_slice %230 {offsets = [0, 0], sizes = [8, 8], strides = [1, 1]} : vector<16x96xf32> to vector<8x8xf32>
    %232 = vector.extract_strided_slice %230 {offsets = [0, 32], sizes = [8, 8], strides = [1, 1]} : vector<16x96xf32> to vector<8x8xf32>
    %233 = vector.extract_strided_slice %230 {offsets = [0, 64], sizes = [8, 8], strides = [1, 1]} : vector<16x96xf32> to vector<8x8xf32>
    %234 = vector.extract_strided_slice %230 {offsets = [0, 8], sizes = [8, 8], strides = [1, 1]} : vector<16x96xf32> to vector<8x8xf32>
    %235 = vector.extract_strided_slice %230 {offsets = [0, 40], sizes = [8, 8], strides = [1, 1]} : vector<16x96xf32> to vector<8x8xf32>
    %236 = vector.extract_strided_slice %230 {offsets = [0, 72], sizes = [8, 8], strides = [1, 1]} : vector<16x96xf32> to vector<8x8xf32>
    %237 = vector.extract_strided_slice %230 {offsets = [0, 16], sizes = [8, 8], strides = [1, 1]} : vector<16x96xf32> to vector<8x8xf32>
    %238 = vector.extract_strided_slice %230 {offsets = [0, 48], sizes = [8, 8], strides = [1, 1]} : vector<16x96xf32> to vector<8x8xf32>
    %239 = vector.extract_strided_slice %230 {offsets = [0, 80], sizes = [8, 8], strides = [1, 1]} : vector<16x96xf32> to vector<8x8xf32>
    %240 = vector.extract_strided_slice %230 {offsets = [0, 24], sizes = [8, 8], strides = [1, 1]} : vector<16x96xf32> to vector<8x8xf32>
    %241 = vector.extract_strided_slice %230 {offsets = [0, 56], sizes = [8, 8], strides = [1, 1]} : vector<16x96xf32> to vector<8x8xf32>
    %242 = vector.extract_strided_slice %230 {offsets = [0, 88], sizes = [8, 8], strides = [1, 1]} : vector<16x96xf32> to vector<8x8xf32>
    %243 = vector.extract_strided_slice %230 {offsets = [8, 0], sizes = [8, 8], strides = [1, 1]} : vector<16x96xf32> to vector<8x8xf32>
    %244 = vector.extract_strided_slice %230 {offsets = [8, 32], sizes = [8, 8], strides = [1, 1]} : vector<16x96xf32> to vector<8x8xf32>
    %245 = vector.extract_strided_slice %230 {offsets = [8, 64], sizes = [8, 8], strides = [1, 1]} : vector<16x96xf32> to vector<8x8xf32>
    %246 = vector.extract_strided_slice %230 {offsets = [8, 8], sizes = [8, 8], strides = [1, 1]} : vector<16x96xf32> to vector<8x8xf32>
    %247 = vector.extract_strided_slice %230 {offsets = [8, 40], sizes = [8, 8], strides = [1, 1]} : vector<16x96xf32> to vector<8x8xf32>
    %248 = vector.extract_strided_slice %230 {offsets = [8, 72], sizes = [8, 8], strides = [1, 1]} : vector<16x96xf32> to vector<8x8xf32>
    %249 = vector.extract_strided_slice %230 {offsets = [8, 16], sizes = [8, 8], strides = [1, 1]} : vector<16x96xf32> to vector<8x8xf32>
    %250 = vector.extract_strided_slice %230 {offsets = [8, 48], sizes = [8, 8], strides = [1, 1]} : vector<16x96xf32> to vector<8x8xf32>
    %251 = vector.extract_strided_slice %230 {offsets = [8, 80], sizes = [8, 8], strides = [1, 1]} : vector<16x96xf32> to vector<8x8xf32>
    %252 = vector.extract_strided_slice %230 {offsets = [8, 24], sizes = [8, 8], strides = [1, 1]} : vector<16x96xf32> to vector<8x8xf32>
    %253 = vector.extract_strided_slice %230 {offsets = [8, 56], sizes = [8, 8], strides = [1, 1]} : vector<16x96xf32> to vector<8x8xf32>
    %254 = vector.extract_strided_slice %230 {offsets = [8, 88], sizes = [8, 8], strides = [1, 1]} : vector<16x96xf32> to vector<8x8xf32>
    %255 = vector.shape_cast %231 : vector<8x8xf32> to vector<1x8x8xf32>
    %256 = vector.shape_cast %234 : vector<8x8xf32> to vector<1x8x8xf32>
    %257 = vector.shape_cast %237 : vector<8x8xf32> to vector<1x8x8xf32>
    %258 = vector.shape_cast %240 : vector<8x8xf32> to vector<1x8x8xf32>
    %259 = vector.shape_cast %243 : vector<8x8xf32> to vector<1x8x8xf32>
    %260 = vector.shape_cast %246 : vector<8x8xf32> to vector<1x8x8xf32>
    %261 = vector.shape_cast %249 : vector<8x8xf32> to vector<1x8x8xf32>
    %262 = vector.shape_cast %252 : vector<8x8xf32> to vector<1x8x8xf32>
    %263 = tpu.concatenate %255, %256, %257, %258, %259, %260, %261, %262 in 0 : vector<1x8x8xf32>, vector<1x8x8xf32>, vector<1x8x8xf32>, vector<1x8x8xf32>, vector<1x8x8xf32>, vector<1x8x8xf32>, vector<1x8x8xf32>, vector<1x8x8xf32> -> vector<8x8x8xf32>
    %264 = vector.shape_cast %232 : vector<8x8xf32> to vector<1x8x8xf32>
    %265 = vector.shape_cast %235 : vector<8x8xf32> to vector<1x8x8xf32>
    %266 = vector.shape_cast %238 : vector<8x8xf32> to vector<1x8x8xf32>
    %267 = vector.shape_cast %241 : vector<8x8xf32> to vector<1x8x8xf32>
    %268 = vector.shape_cast %244 : vector<8x8xf32> to vector<1x8x8xf32>
    %269 = vector.shape_cast %247 : vector<8x8xf32> to vector<1x8x8xf32>
    %270 = vector.shape_cast %250 : vector<8x8xf32> to vector<1x8x8xf32>
    %271 = vector.shape_cast %253 : vector<8x8xf32> to vector<1x8x8xf32>
    %272 = tpu.concatenate %264, %265, %266, %267, %268, %269, %270, %271 in 0 : vector<1x8x8xf32>, vector<1x8x8xf32>, vector<1x8x8xf32>, vector<1x8x8xf32>, vector<1x8x8xf32>, vector<1x8x8xf32>, vector<1x8x8xf32>, vector<1x8x8xf32> -> vector<8x8x8xf32>
    %273 = vector.shape_cast %233 : vector<8x8xf32> to vector<1x8x8xf32>
    %274 = vector.shape_cast %236 : vector<8x8xf32> to vector<1x8x8xf32>
    %275 = vector.shape_cast %239 : vector<8x8xf32> to vector<1x8x8xf32>
    %276 = vector.shape_cast %242 : vector<8x8xf32> to vector<1x8x8xf32>
    %277 = vector.shape_cast %245 : vector<8x8xf32> to vector<1x8x8xf32>
    %278 = vector.shape_cast %248 : vector<8x8xf32> to vector<1x8x8xf32>
    %279 = vector.shape_cast %251 : vector<8x8xf32> to vector<1x8x8xf32>
    %280 = vector.shape_cast %254 : vector<8x8xf32> to vector<1x8x8xf32>
    %281 = tpu.concatenate %273, %274, %275, %276, %277, %278, %279, %280 in 0 : vector<1x8x8xf32>, vector<1x8x8xf32>, vector<1x8x8xf32>, vector<1x8x8xf32>, vector<1x8x8xf32>, vector<1x8x8xf32>, vector<1x8x8xf32>, vector<1x8x8xf32> -> vector<8x8x8xf32>
    "tpu.trace_start"() <{level = 10 : i32, message = "bqd,bkd->bqk"}> : () -> ()
    %cst_89 = arith.constant dense<0.000000e+00> : vector<8x8x8xf32>
    %282 = tpu.matmul %263, %272, %cst_89 {dimension_numbers = #tpu.dot_dimension_numbers<[2], [2], [1], [1], [0, 0, 0, 1, 1, 1], [0], [0]>} : vector<8x8x8xf32>, vector<8x8x8xf32>, vector<8x8x8xf32> -> vector<8x8x8xf32>
    %cst_90 = arith.constant 0.000000e+00 : f32
    "tpu.trace_stop"() : () -> ()
    %283 = vector.broadcast %cst_90 : f32 to vector<8x1x8xf32>
    %284 = arith.cmpf oeq, %1, %283 : vector<8x1x8xf32>
    %cst_91 = arith.constant -1.000000e+09 : f32
    %285 = vector.shape_cast %284 : vector<8x1x8xi1> to vector<8x1x8xi1>
    %286 = vector.broadcast %285 : vector<8x1x8xi1> to vector<8x8x8xi1>
    %287 = vector.broadcast %cst_91 : f32 to vector<8x8x8xf32>
    %288 = arith.select %286, %287, %282 : vector<8x8x8xi1>, vector<8x8x8xf32>
    %cst_92 = arith.constant dense<0xFF800000> : vector<8x8xf32>
    %289 = vector.multi_reduction <maximumf>, %288, %cst_92 [2] : vector<8x8x8xf32> to vector<8x8xf32>
    %290 = vector.shape_cast %289 : vector<8x8xf32> to vector<8x8x1xf32>
    %291 = vector.broadcast %290 : vector<8x8x1xf32> to vector<8x8x8xf32>
    %292 = arith.subf %288, %291 : vector<8x8x8xf32>
    %293 = math.exp %292 : vector<8x8x8xf32>
    %cst_93 = arith.constant dense<0.000000e+00> : vector<8x8xf32>
    %294 = vector.multi_reduction <add>, %293, %cst_93 [2] : vector<8x8x8xf32> to vector<8x8xf32>
    %295 = vector.shape_cast %294 : vector<8x8xf32> to vector<8x8x1xf32>
    %296 = tpu.reciprocal %295 {approx = true} : vector<8x8x1xf32> -> vector<8x8x1xf32>
    %297 = vector.broadcast %296 : vector<8x8x1xf32> to vector<8x8x8xf32>
    %298 = arith.mulf %293, %297 : vector<8x8x8xf32>
    "tpu.trace_start"() <{level = 10 : i32, message = "bqk,bkd->bqd"}> : () -> ()
    %cst_94 = arith.constant dense<0.000000e+00> : vector<8x8x8xf32>
    %299 = tpu.matmul %298, %281, %cst_94 {dimension_numbers = #tpu.dot_dimension_numbers<[2], [1], [1], [2], [0, 0, 0, 1, 1, 2], [0], [0]>} : vector<8x8x8xf32>, vector<8x8x8xf32>, vector<8x8x8xf32> -> vector<8x8x8xf32>
    "tpu.trace_stop"() : () -> ()
    %300 = vector.extract_strided_slice %299 {offsets = [0, 0, 0], sizes = [1, 8, 8], strides = [1, 1, 1]} : vector<8x8x8xf32> to vector<1x8x8xf32>
    %301 = vector.shape_cast %300 : vector<1x8x8xf32> to vector<8x8xf32>
    %302 = vector.extract_strided_slice %299 {offsets = [1, 0, 0], sizes = [1, 8, 8], strides = [1, 1, 1]} : vector<8x8x8xf32> to vector<1x8x8xf32>
    %303 = vector.shape_cast %302 : vector<1x8x8xf32> to vector<8x8xf32>
    %304 = vector.extract_strided_slice %299 {offsets = [2, 0, 0], sizes = [1, 8, 8], strides = [1, 1, 1]} : vector<8x8x8xf32> to vector<1x8x8xf32>
    %305 = vector.shape_cast %304 : vector<1x8x8xf32> to vector<8x8xf32>
    %306 = vector.extract_strided_slice %299 {offsets = [3, 0, 0], sizes = [1, 8, 8], strides = [1, 1, 1]} : vector<8x8x8xf32> to vector<1x8x8xf32>
    %307 = vector.shape_cast %306 : vector<1x8x8xf32> to vector<8x8xf32>
    %308 = tpu.concatenate %301, %303, %305, %307 in 1 : vector<8x8xf32>, vector<8x8xf32>, vector<8x8xf32>, vector<8x8xf32> -> vector<8x32xf32>
    %309 = vector.extract_strided_slice %299 {offsets = [4, 0, 0], sizes = [1, 8, 8], strides = [1, 1, 1]} : vector<8x8x8xf32> to vector<1x8x8xf32>
    %310 = vector.shape_cast %309 : vector<1x8x8xf32> to vector<8x8xf32>
    %311 = vector.extract_strided_slice %299 {offsets = [5, 0, 0], sizes = [1, 8, 8], strides = [1, 1, 1]} : vector<8x8x8xf32> to vector<1x8x8xf32>
    %312 = vector.shape_cast %311 : vector<1x8x8xf32> to vector<8x8xf32>
    %313 = vector.extract_strided_slice %299 {offsets = [6, 0, 0], sizes = [1, 8, 8], strides = [1, 1, 1]} : vector<8x8x8xf32> to vector<1x8x8xf32>
    %314 = vector.shape_cast %313 : vector<1x8x8xf32> to vector<8x8xf32>
    %315 = vector.extract_strided_slice %299 {offsets = [7, 0, 0], sizes = [1, 8, 8], strides = [1, 1, 1]} : vector<8x8x8xf32> to vector<1x8x8xf32>
    %316 = vector.shape_cast %315 : vector<1x8x8xf32> to vector<8x8xf32>
    %317 = tpu.concatenate %310, %312, %314, %316 in 1 : vector<8x8xf32>, vector<8x8xf32>, vector<8x8xf32>, vector<8x8xf32> -> vector<8x32xf32>
    %318 = tpu.concatenate %308, %317 in 0 : vector<8x32xf32>, vector<8x32xf32> -> vector<16x32xf32>
    %cst_95 = arith.constant dense<0.000000e+00> : vector<16x32xf32>
    %319 = tpu.matmul %318, %226, %cst_95 {dimension_numbers = #tpu.dot_dimension_numbers<[1], [0], [0], [1], [0, 0, 1, 1], [], []>} : vector<16x32xf32>, vector<32x32xf32>, vector<16x32xf32> -> vector<16x32xf32>
    %320 = vector.broadcast %227 : vector<1x32xf32> to vector<16x32xf32>
    %321 = arith.addf %319, %320 : vector<16x32xf32>
    %322 = arith.addf %203, %321 : vector<16x32xf32>
    %cst_96 = arith.constant dense<0.000000e+00> : vector<16xf32>
    %323 = vector.multi_reduction <add>, %322, %cst_96 [1] : vector<16x32xf32> to vector<16xf32>
    %324 = vector.shape_cast %323 : vector<16xf32> to vector<16x1xf32>
    %cst_97 = arith.constant 3.200000e+01 : f32
    %325 = vector.broadcast %cst_97 : f32 to vector<16x1xf32>
    %326 = arith.divf %324, %325 : vector<16x1xf32>
    %327 = vector.broadcast %326 : vector<16x1xf32> to vector<16x32xf32>
    %328 = arith.subf %322, %327 : vector<16x32xf32>
    %329 = arith.mulf %328, %328 : vector<16x32xf32>
    %cst_98 = arith.constant dense<0.000000e+00> : vector<16xf32>
    %330 = vector.multi_reduction <add>, %329, %cst_98 [1] : vector<16x32xf32> to vector<16xf32>
    %331 = vector.shape_cast %330 : vector<16xf32> to vector<16x1xf32>
    %cst_99 = arith.constant 0.0322580636 : f32
    %332 = vector.broadcast %cst_99 : f32 to vector<16x1xf32>
    %333 = arith.mulf %331, %332 : vector<16x1xf32>
    %334 = math.sqrt %333 : vector<16x1xf32>
    %cst_100 = arith.constant 9.99999997E-7 : f32
    %335 = vector.broadcast %cst_100 : f32 to vector<16x1xf32>
    %336 = arith.addf %334, %335 : vector<16x1xf32>
    %337 = vector.broadcast %336 : vector<16x1xf32> to vector<16x32xf32>
    %338 = arith.divf %328, %337 : vector<16x32xf32>
    %339 = vector.broadcast %8 : vector<1x32xf32> to vector<16x32xf32>
    %340 = arith.mulf %339, %338 : vector<16x32xf32>
    %341 = vector.broadcast %9 : vector<1x32xf32> to vector<16x32xf32>
    %342 = arith.addf %340, %341 : vector<16x32xf32>
    %c0_101 = arith.constant 0 : index
    %c0_102 = arith.constant 0 : index
    %343 = vector.load %arg24[%c0_101, %c0_102] : memref<32x128xf32, #tpu.memory_space<vmem>>, vector<32x128xf32>
    %cst_103 = arith.constant dense<0.000000e+00> : vector<16x128xf32>
    %344 = tpu.matmul %342, %343, %cst_103 {dimension_numbers = #tpu.dot_dimension_numbers<[1], [0], [0], [1], [0, 0, 1, 1], [], []>} : vector<16x32xf32>, vector<32x128xf32>, vector<16x128xf32> -> vector<16x128xf32>
    %c0_104 = arith.constant 0 : index
    %c0_105 = arith.constant 0 : index
    %345 = vector.load %arg25[%c0_104, %c0_105] : memref<1x128xf32, #tpu.memory_space<vmem>>, vector<1x128xf32>
    %346 = vector.broadcast %345 : vector<1x128xf32> to vector<16x128xf32>
    %347 = arith.addf %344, %346 : vector<16x128xf32>
    %cst_106 = arith.constant 0.707106769 : f32
    %348 = vector.broadcast %cst_106 : f32 to vector<16x128xf32>
    %349 = arith.mulf %347, %348 : vector<16x128xf32>
    %350 = math.absf %349 : vector<16x128xf32>
    %cst_107 = arith.constant 0.327591091 : f32
    %351 = vector.broadcast %cst_107 : f32 to vector<16x128xf32>
    %352 = arith.mulf %351, %350 : vector<16x128xf32>
    %cst_108 = arith.constant 1.000000e+00 : f32
    %353 = vector.broadcast %cst_108 : f32 to vector<16x128xf32>
    %354 = arith.addf %353, %352 : vector<16x128xf32>
    %cst_109 = arith.constant 1.000000e+00 : f32
    %355 = vector.broadcast %cst_109 : f32 to vector<16x128xf32>
    %356 = arith.divf %355, %354 : vector<16x128xf32>
    %cst_110 = arith.constant 1.06140542 : f32
    %357 = vector.broadcast %cst_110 : f32 to vector<16x128xf32>
    %358 = arith.mulf %357, %356 : vector<16x128xf32>
    %cst_111 = arith.constant 1.45315206 : f32
    %359 = vector.broadcast %cst_111 : f32 to vector<16x128xf32>
    %360 = arith.subf %358, %359 : vector<16x128xf32>
    %361 = arith.mulf %360, %356 : vector<16x128xf32>
    %cst_112 = arith.constant 1.42141378 : f32
    %362 = vector.broadcast %cst_112 : f32 to vector<16x128xf32>
    %363 = arith.addf %361, %362 : vector<16x128xf32>
    %364 = arith.mulf %363, %356 : vector<16x128xf32>
    %cst_113 = arith.constant 0.284496725 : f32
    %365 = vector.broadcast %cst_113 : f32 to vector<16x128xf32>
    %366 = arith.subf %364, %365 : vector<16x128xf32>
    %367 = arith.mulf %366, %356 : vector<16x128xf32>
    %cst_114 = arith.constant 0.254829586 : f32
    %368 = vector.broadcast %cst_114 : f32 to vector<16x128xf32>
    %369 = arith.addf %367, %368 : vector<16x128xf32>
    %370 = arith.mulf %369, %356 : vector<16x128xf32>
    %cst_115 = arith.constant 0.000000e+00 : f32
    %371 = vector.broadcast %cst_115 : f32 to vector<16x128xf32>
    %372 = arith.subf %371, %350 : vector<16x128xf32>
    %373 = arith.mulf %372, %350 : vector<16x128xf32>
    %374 = math.exp %373 : vector<16x128xf32>
    %375 = arith.mulf %370, %374 : vector<16x128xf32>
    %cst_116 = arith.constant 1.000000e+00 : f32
    %376 = vector.broadcast %cst_116 : f32 to vector<16x128xf32>
    %377 = arith.subf %376, %375 : vector<16x128xf32>
    %cst_117 = arith.constant 0.000000e+00 : f32
    %378 = vector.broadcast %cst_117 : f32 to vector<16x128xf32>
    %379 = arith.cmpf oge, %349, %378 : vector<16x128xf32>
    %cst_118 = arith.constant 0.000000e+00 : f32
    %380 = vector.broadcast %cst_118 : f32 to vector<16x128xf32>
    %381 = arith.subf %380, %377 : vector<16x128xf32>
    %382 = arith.select %379, %377, %381 : vector<16x128xi1>, vector<16x128xf32>
    %cst_119 = arith.constant 5.000000e-01 : f32
    %383 = vector.broadcast %cst_119 : f32 to vector<16x128xf32>
    %384 = arith.mulf %383, %347 : vector<16x128xf32>
    %cst_120 = arith.constant 1.000000e+00 : f32
    %385 = vector.broadcast %cst_120 : f32 to vector<16x128xf32>
    %386 = arith.addf %385, %382 : vector<16x128xf32>
    %387 = arith.mulf %384, %386 : vector<16x128xf32>
    %c0_121 = arith.constant 0 : index
    %c0_122 = arith.constant 0 : index
    %388 = vector.load %arg26[%c0_121, %c0_122] : memref<128x1xf32, #tpu.memory_space<vmem>>, vector<128x1xf32>
    %cst_123 = arith.constant dense<0.000000e+00> : vector<16x1xf32>
    %389 = tpu.matmul %387, %388, %cst_123 {dimension_numbers = #tpu.dot_dimension_numbers<[1], [0], [0], [1], [0, 0, 1, 1], [], []>} : vector<16x128xf32>, vector<128x1xf32>, vector<16x1xf32> -> vector<16x1xf32>
    %c0_124 = arith.constant 0 : index
    %c0_125 = arith.constant 0 : index
    %390 = vector.load %arg27[%c0_124, %c0_125] : memref<1x1xf32, #tpu.memory_space<vmem>>, vector<1x1xf32>
    %391 = vector.broadcast %390 : vector<1x1xf32> to vector<16x1xf32>
    %392 = arith.addf %389, %391 : vector<16x1xf32>
    %c0_126 = arith.constant 0 : index
    %c0_127 = arith.constant 0 : index
    %393 = vector.load %arg28[%c0_126, %c0_127] : memref<16x1xf32, #tpu.memory_space<vmem>>, vector<16x1xf32>
    tpu.vector_store %arg28[%c0_126, %c0_127], %392 {strides = array<i32>} : memref<16x1xf32, #tpu.memory_space<vmem>>, vector<16x1xf32>,
    return
  }
}

</mosaic_0001>

<bundles_post_ra>
// kernel: tpu_custom_call.1
= control target key start
LH: loop header
LB: loop body
LE: loop exit
PB: predicated region body
PF: predicated region fallthrough
CT: control target
= control target key end

     0   :  { %vm113_vm0 = vcmask 130048   ;;  %vm195_vm1 = vcmask 261120   ;;  %v4828_v55 = vmov 0.0   ;;  %vm4829_vm6 = vmmov 0   ;;  %s4830_s30 = smov 112   ;;  %s5762_s2 = inlined_call_operand.vmem [shape: f32[16,32], index: 2, kind: input, shape index: {}]   ;;  %s5763_s0 = inlined_call_operand.vmem [shape: f32[16,16], index: 0, kind: input, shape index: {}]   ;;  %s5764_s3 = inlined_call_operand.vmem [shape: f32[16,32], index: 3, kind: input, shape index: {}]   ;;  %s5765_s4 = inlined_call_operand.vmem [shape: f32[32,96], index: 4, kind: input, shape index: {}]   ;;  %s5766_s8 = inlined_call_operand.vmem [shape: f32[1,32], index: 8, kind: input, shape index: {}]   ;;  %s5767_s9 = inlined_call_operand.vmem [shape: f32[1,32], index: 9, kind: input, shape index: {}]   ;;  %s5768_s5 = inlined_call_operand.vmem [shape: f32[1,96], index: 5, kind: input, shape index: {}]   ;;  %s5769_s1 = inlined_call_operand.vmem [shape: f32[8,1,8], index: 1, kind: input, shape index: {}]   ;;  %s5770_s6 = inlined_call_operand.vmem [shape: f32[32,32], index: 6, kind: input, shape index: {}]   ;;  %s5771_s7 = inlined_call_operand.vmem [shape: f32[1,32], index: 7, kind: input, shape index: {}]   ;;  %s5772_s12 = inlined_call_operand.vmem [shape: f32[32,128], index: 12, kind: input, shape index: {}]   ;;  %s5773_s10 = inlined_call_operand.vmem [shape: f32[1,32], index: 10, kind: input, shape index: {}]   ;;  %s5774_s11 = inlined_call_operand.vmem [shape: f32[1,32], index: 11, kind: input, shape index: {}]   ;;  %s5775_s14 = inlined_call_operand.vmem [shape: f32[128,32], index: 14, kind: input, shape index: {}]   ;;  %s5776_s13 = inlined_call_operand.vmem [shape: f32[1,128], index: 13, kind: input, shape index: {}]   ;;  %s5777_s15 = inlined_call_operand.vmem [shape: f32[1,32], index: 15, kind: input, shape index: {}]   ;;  %s5778_s20 = inlined_call_operand.vmem [shape: f32[32,96], index: 20, kind: input, shape index: {}]   ;;  %s5779_s16 = inlined_call_operand.vmem [shape: f32[1,32], index: 16, kind: input, shape index: {}]   ;;  %s5780_s17 = inlined_call_operand.vmem [shape: f32[1,32], index: 17, kind: input, shape index: {}]   ;;  %s5781_s21 = inlined_call_operand.vmem [shape: f32[1,96], index: 21, kind: input, shape index: {}]   ;;  %s5782_s22 = inlined_call_operand.vmem [shape: f32[32,32], index: 22, kind: input, shape index: {}]   ;;  %s5783_s23 = inlined_call_operand.vmem [shape: f32[1,32], index: 23, kind: input, shape index: {}]   ;;  %s5784_s24 = inlined_call_operand.vmem [shape: f32[32,128], index: 24, kind: input, shape index: {}]   ;;  %s5785_s18 = inlined_call_operand.vmem [shape: f32[1,32], index: 18, kind: input, shape index: {}]   ;;  %s5786_s19 = inlined_call_operand.vmem [shape: f32[1,32], index: 19, kind: input, shape index: {}]   ;;  %s5787_s26 = inlined_call_operand.vmem [shape: f32[128,1], index: 26, kind: input, shape index: {}]   ;;  %s5788_s27 = inlined_call_operand.<no memory space> [shape: f32[1,1], index: 27, kind: input, shape index: {}]   ;;  %s5789_s25 = inlined_call_operand.vmem [shape: f32[1,128], index: 25, kind: input, shape index: {}]   ;;  %s5790_s28 = inlined_call_operand.vmem [shape: f32[16,1], index: 28, kind: output, shape index: {}]  }
   0x1   :  { %5803 = sst [smem:[#allocation3_spill]] %s5762_s2  ;;  %4324 = vmatprep.subr.mxu1 %v4828_v55  ;;  %4326 = vmatprep.mubr.msk.f32.mxu1 %vm4829_vm6, %v4828_v55  ;;  %vm366_vm7 = vcmask 64512  }
   0x2   :  { %5804 = sst [smem:[#allocation4_spill]] %s5763_s0 }
   0x3   :  { %5805 = sst [smem:[#allocation5_spill]] %s5764_s3  ;;  %s5817_s0 = sld [smem:[#allocation4_spill]] }
   0x4   :  { %5806 = sst [smem:[#allocation6_spill]] %s5765_s4  ;;  %s4831_s4 = smov 120  }
   0x5   :  { %5807 = sst [smem:[#allocation7_spill]] %s5766_s8  ;;  %s5800_s8 = smov 24  }
   0x6   :  { %5808 = sst [smem:[#allocation8_spill]] %s5767_s9  ;;  %s5816_s9 = sld [smem:[#allocation3_spill]] }
   0x7   :  { %5809 = sst [smem:[#allocation9_spill]] %s5768_s5  ;;  %s5820_s3 = sld [smem:[#allocation7_spill]] }
   0x8   :  { %5810 = sst [smem:[#allocation10_spill]] %s5769_s1  ;;  %s5821_s2 = sld [smem:[#allocation8_spill]] }
   0x9   :  { %5811 = sst [smem:[#allocation11_spill]] %s5770_s6  ;;  %v91_v2 = vld [vmem:[%s5817_s0] sm:$0xff]  ;;  %v92_v4 = vld [vmem:[%s5817_s0 + $0x8] sm:$0xff]  ;;  %s4832_s5 = smov 104  }
   0xa   :  { %5812 = sst [smem:[#allocation12_spill]] %s5771_s7  ;;  %4290 = vmatprep.mubr.msk.f32.mxu0 %vm113_vm0, %v91_v2  ;;  %s5823_s29 = sld [smem:[#allocation10_spill]] }
   0xb   :  { %5813 = sst [smem:[#allocation13_spill]] %s5772_s12  ;;  %s4833_s12 = smov 96  }
   0xc   :  { %5814 = sst [smem:[#allocation14_spill]] %s5773_s10  ;;  %v109_v0 = vld [vmem:[%s5816_s9] sm:$0xff]  ;;  %v110_v1 = vld [vmem:[%s5816_s9 + $0x8] sm:$0xff]  ;;  %s5798_s1 = smov 64  }
   0xd   :  { %5815 = sst [smem:[#allocation15_spill]] %s5774_s11  ;;  %v4589_v3 = vpack.c.bf16 %v110_v1, %v109_v0  ;;  %s5818_s11 = sld [smem:[#allocation5_spill]]  ;;  %v4062_v46 = vld [vmem:[%s5820_s3] ss:$0 sm:$0xff] }
   0xe   :  { %s5819_s9 = sld [smem:[#allocation6_spill]]  ;;  %v4063_v48 = vld [vmem:[%s5821_s2] ss:$0 sm:$0xff]  ;;  %s4837_s7 = smov 16  }
   0xf   :  { %4590 = vmatprep.subr.bf16.mxu0 %v4589_v3  ;;  %s5840_s0 = sld [smem:[#allocation11_spill]]  ;;  %s5843_s3 = sld [smem:[#allocation14_spill]] }
  0x10   :  { %4592 = vmatpush3.bf16.msra.mxu0 %v4589_v3  ;;  %s5844_s2 = sld [smem:[#allocation15_spill]] }
  0x13   :  { %4291 = vmatmul.mubr.msk.f32.vlgmr.msra.gmra.mrb[0].mxu0 %vm113_vm0, %v92_v4  ;;  %v111_v5 = vld [vmem:[%s5818_s11] sm:$0xff]  ;;  %v112_v7 = vld [vmem:[%s5818_s11 + $0x8] sm:$0xff]  ;;  %s5842_s11 = sld [smem:[#allocation13_spill]] }
  0x14   :  { %v253_v23 = vld [vmem:[%s5819_s9] sm:$0xff]  ;;  %v254_v24 = vld [vmem:[%s5819_s9 + $0x8] sm:$0xff]  ;;  %v255_v25 = vld [vmem:[%s5819_s9 + $0x10] sm:$0xff] }
  0x15   :  { %v4593_v26 = vpack.c.bf16 %v254_v24, %v253_v23  ;;  %v256_v27 = vld [vmem:[%s5819_s9 + $0x18] sm:$0xff]  ;;  %s5822_s9 = sld [smem:[#allocation9_spill]] }
  0x16   :  { %v4597_v28 = vpack.c.bf16 %v256_v27, %v255_v25  ;;  %v94_v25 = vld [vmem:[%s5823_s29 + $0x1] sm:$0x1] }
  0x17   :  { %4594 = vmatprep.subr.bf16.mxu0 %v4593_v26  ;;  %vm974_vm10 = vcmp.eq.f32.partialorder %v94_v25, 0.0 }
  0x18   :  { %4596 = vmatpush3.bf16.msra.mxu0 %v4593_v26  ;;  %v95_v26 = vld [vmem:[%s5823_s29 + $0x2] sm:$0x1] }
  0x19   :  { %4598 = vmatprep.subr.bf16.mxu0 %v4597_v28  ;;  %vm975_vm11 = vcmp.eq.f32.partialorder %v95_v26, 0.0 }
  0x1b   :  { %v4064_v56 = vld [vmem:[%s5822_s9] ss:$0 sm:$0xff] }
  0x1c   :  { %4600 = vmatpush3.bf16.msra.mxu0 %v4597_v28  ;;  %v96_v28 = vld [vmem:[%s5823_s29 + $0x3] sm:$0x1] }
  0x1d   :  { %4304 = vmatprep.subr.mxu0 %v4828_v55  ;;  %vm976_vm12 = vcmp.eq.f32.partialorder %v96_v28, 0.0 }
  0xe6   :  { %v4292_v6 = vpop.f32.mrb[0].mxu0 }
  0xe7   :  { %v186_v8 = vpop.f32.mrb[1].mxu0  ;;  %v5006_v10 = vadd.f32 %v4292_v6, %v112_v7 }
  0xe8   :  { %v5004_v9 = vadd.f32 %v186_v8, %v111_v5 }
  0xe9   :  { %v199_v12 = vsel %vm195_vm1, %v5006_v10, 0.0 }
  0xea   :  { %v196_v11 = vsel %vm195_vm1, %v5004_v9, 0.0 }
  0xeb   :  { %197 = vadd.xlane.f32.xlu0 %v196_v11 }
  0xef   :  { %200 = vadd.xlane.f32.xlu0 %v199_v12 }
 0x178   :  { %v198_v13 = vpop.xlane.xlu0 %197 }
 0x179   :  { %v203_v14 = vmul.f32 0.03125, %v198_v13  ;;  %v989_v13 = vlaneseq }
 0x17b   :  { %v205_v15 = vsub.f32 %v5004_v9, %v203_v14  ;;  %v93_v14 = vld [vmem:[%s5823_s29] sm:$0x1] }
 0x17c   :  { %v201_v16 = vpop.xlane.xlu0 %200  ;;  %vm973_vm8 = vcmp.eq.f32.partialorder %v93_v14, 0.0 }
 0x17d   :  { %v204_v17 = vmul.f32 0.03125, %v201_v16  ;;  %v207_v18 = vmul.f32 %v205_v15, %v205_v15 }
 0x17f   :  { %v206_v19 = vsub.f32 %v5006_v10, %v204_v17  ;;  %v209_v20 = vsel %vm195_vm1, %v207_v18, 0.0  ;;  %v4834_v17 = vmov 0  }
 0x180   :  { %210 = vadd.xlane.f32.xlu1 %v209_v20  ;;  %v981_v18 = vsel %vm973_vm8, 1, %v4834_v17  ;;  %v982_v27 = vsel %vm974_vm10, 1, %v4834_v17 }
 0x181   :  { %v208_v21 = vmul.f32 %v206_v19, %v206_v19 }
 0x183   :  { %v212_v22 = vsel %vm195_vm1, %v208_v21, 0.0 }
 0x184   :  { %213 = vadd.xlane.f32.xlu1 %v212_v22 }
 0x20d   :  { %v211_v29 = vpop.xlane.xlu1 %210 }
 0x20e   :  { %v215_v30 = vmul.f32 0.032258064, %v211_v29 }
 0x210   :  { %4716 = vrsqrt.f32 %v215_v30  ;;  %vm219_vm2 = vcmp.eq.f32.partialorder %v215_v30, inf  ;;  %v222_v35 = vand.u32 2147483648, %v215_v30  ;;  %vm221_vm3 = vcmp.eq.f32.partialorder %v215_v30, 0.0 }
 0x211   :  { %v214_v31 = vpop.xlane.xlu1 %213 }
 0x212   :  { %v216_v32 = vmul.f32 0.032258064, %v214_v31  ;;  %v97_v31 = vld [vmem:[%s5823_s29 + $0x4] sm:$0x1] }
 0x213   :  { %vm977_vm14 = vcmp.eq.f32.partialorder %v97_v31, 0.0 }
 0x214   :  { %4718 = vrsqrt.f32 %v216_v32  ;;  %vm226_vm4 = vcmp.eq.f32.partialorder %v216_v32, inf  ;;  %v229_v41 = vand.u32 2147483648, %v216_v32  ;;  %vm228_vm5 = vcmp.eq.f32.partialorder %v216_v32, 0.0 }
 0x21a   :  { %v4717_v33 = vpop.eup %4716 }
 0x21b   :  { %v218_v34 = vmul.f32 %v4717_v33, %v215_v30 }
 0x21d   :  { %v220_v36 = vsel %vm219_vm2, %v215_v30, %v218_v34  ;;  %v983_v30 = vsel %vm975_vm11, 1, %v4834_v17  ;;  %v984_v34 = vsel %vm976_vm12, 1, %v4834_v17 }
 0x21e   :  { %v4719_v37 = vpop.eup %4718  ;;  %v223_v38 = vsel %vm221_vm3, %v222_v35, %v220_v36  ;;  %v99_v35 = vld [vmem:[%s5823_s29 + $0x6] sm:$0x1] }
 0x21f   :  { %v231_v39 = vadd.f32 1e-06, %v223_v38  ;;  %v225_v40 = vmul.f32 %v4719_v37, %v216_v32  ;;  %vm979_vm2 = vcmp.eq.f32.partialorder %v99_v35, 0.0 }
 0x221   :  { %v227_v42 = vsel %vm226_vm4, %v216_v32, %v225_v40  ;;  %4720 = vrcp.f32 %v231_v39  ;;  %v985_v39 = vsel %vm977_vm14, 1, %v4834_v17  ;;  %vm5802_vm14 = vcmask 195584  }
 0x222   :  { %v230_v43 = vsel %vm228_vm5, %v229_v41, %v227_v42 }
 0x223   :  { %v232_v44 = vadd.f32 1e-06, %v230_v43 }
 0x225   :  { %4722 = vrcp.f32 %v232_v44 }
 0x22b   :  { %v4721_v45 = vpop.eup %4720 }
 0x22c   :  { %v234_v47 = vmul.f32 %v4721_v45, %v205_v15  ;;  %v990_v15 = vshrl.u32 %v989_v13, 7 }
 0x22e   :  { %v243_v49 = vmul.f32 %v4062_v46, %v234_v47  ;;  %v5140_v16 = vsub.s32 0, %v990_v15 }
 0x22f   :  { %v4723_v50 = vpop.eup %4722 }
 0x230   :  { %v236_v51 = vmul.f32 %v4723_v50, %v206_v19  ;;  %v251_v52 = vadd.f32 %v4063_v48, %v243_v49  ;;  %v992_v19 = vrot.slane %v981_v18, %v5140_v16  ;;  %v996_v29 = vrot.slane %v982_v27, %v5140_v16  ;;  %v98_v18 = vld [vmem:[%s5823_s29 + $0x5] sm:$0x1] }
 0x231   :  { %v1000_v33 = vrot.slane %v983_v30, %v5140_v16  ;;  %v1004_v42 = vrot.slane %v984_v34, %v5140_v16  ;;  %v1008_v45 = vrot.slane %v985_v39, %v5140_v16  ;;  %v987_v49 = vsel %vm979_vm2, 1, %v4834_v17 }
 0x232   :  { %v244_v53 = vmul.f32 %v4062_v46, %v236_v51  ;;  %4301 = vmatprep.mubr.msk.f32.mxu0 %vm195_vm1, %v251_v52  ;;  %vm5144_vm9 = vcmp.eq.s32.totalorder %v992_v19, 1  ;;  %vm5169_vm13 = vcmp.eq.s32.totalorder %v996_v29, 1  ;;  %vm978_vm8 = vcmp.eq.f32.partialorder %v98_v18, 0.0  ;;  %v100_v19 = vld [vmem:[%s5823_s29 + $0x7] sm:$0x1]  ;;  %s4836_s29 = smov 8  }
 0x233   :  { %vm5182_vm15 = vcmp.eq.s32.totalorder %v1000_v33, 1  ;;  %vm5195_vm3 = vcmp.eq.s32.totalorder %v1004_v42, 1  ;;  %vm5199_vm4 = vcmp.eq.s32.totalorder %v1008_v45, 1  ;;  %vm980_vm10 = vcmp.eq.f32.partialorder %v100_v19, 0.0 }
 0x234   :  { %v252_v54 = vadd.f32 %v4063_v48, %v244_v53 }
 0x236   :  { %4302 = vmatmul.mubr.msk.f32.vlgmr.msra.gmra.mrb[2].mxu0 %vm195_vm1, %v252_v54 }
 0x237   :  { %4306 = vmatprep.mubr.msk.f32.mxu0 %vm4829_vm6, %v4828_v55 }
 0x309   :  { %v4303_v57 = vpop.f32.mrb[2].mxu0 }
 0x30a   :  { %v341_v58 = vpop.f32.mrb[3].mxu0  ;;  %v5051_v60 = vadd.f32 %v4303_v57, %v4064_v56 }
 0x30b   :  { %v5045_v59 = vadd.f32 %v4064_v56, %v341_v58  ;;  %v1016_v56 = vrot.slane %v987_v49, %v5140_v16 }
 0x30d   :  { %353 = vrot.lane.b32.xlu1 %v5045_v59, %s4830_s30  ;;  %351 = vrot.lane.b32.xlu0 %v5045_v59, %s4831_s4  ;;  %vm5212_vm5 = vcmp.eq.s32.totalorder %v1016_v56, 1 }
 0x311   :  { %355 = vrot.lane.b32.xlu1 %v5045_v59, %s4832_s5  ;;  %360 = vrot.lane.b32.xlu0 %v5051_v60, %s4830_s30 }
 0x315   :  { %358 = vrot.lane.b32.xlu1 %v5051_v60, %s4831_s4  ;;  %364 = vrot.lane.b32.xlu0 %v5045_v59, %s4833_s12 }
 0x319   :  { %362 = vrot.lane.b32.xlu1 %v5051_v60, %s4832_s5 }
 0x37f   :  { %v5063_v61 = vpop.permute.xlu1 %353  ;;  %v5065_v62 = vpop.permute.xlu0 %351 }
 0x380   :  { %517 = vrot.lane.b32.xlu0 %v5063_v61, %s4833_s12  ;;  %441 = vrot.lane.b32.xlu1 %v5065_v62, %s4833_s12 }
 0x383   :  { %v5071_v63 = vpop.permute.xlu1 %355  ;;  %v5073_v0 = vpop.permute.xlu0 %360 }
 0x384   :  { %669 = vrot.lane.b32.xlu0 %v5051_v60, %s4833_s12  ;;  %593 = vrot.lane.b32.xlu1 %v5071_v63, %s4833_s12 }
 0x387   :  { %v5079_v1 = vpop.permute.xlu1 %358  ;;  %v365_v2 = vpop.permute.xlu0 %364 }
 0x388   :  { %745 = vrot.lane.b32.xlu1 %v5079_v1, %s4833_s12  ;;  %821 = vrot.lane.b32.xlu0 %v5073_v0, %s4833_s12 }
 0x389   :  { %4305 = vmatpush3.xpose.msk.msra.mxu0 %vm366_vm7, %v365_v2 }
 0x38a   :  { %4309 = vmatprep.subr.mxu0 %v4828_v55 }
 0x38b   :  { %v5087_v3 = vpop.permute.xlu1 %362 }
 0x38c   :  { %4307 = vmatmul.mubr.msk.f32.vlgmr.msra.gmra.mrb[4].mxu0 %vm366_vm7, %v5045_v59  ;;  %897 = vrot.lane.b32.xlu1 %v5087_v3, %s4833_s12 }
 0x38d   :  { %4311 = vmatprep.mubr.msk.f32.mxu0 %vm4829_vm6, %v4828_v55 }
 0x3f2   :  { %v442_v4 = vpop.permute.xlu1 %441  ;;  %v518_v5 = vpop.permute.xlu0 %517 }
 0x3f3   :  { %4310 = vmatpush3.xpose.msk.msra.mxu0 %vm366_vm7, %v442_v4 }
 0x3f4   :  { %4314 = vmatprep.subr.mxu0 %v4828_v55 }
 0x3f6   :  { %v594_v6 = vpop.permute.xlu1 %593  ;;  %4312 = vmatmul.mubr.msk.f32.vlgmr.msra.gmra.mrb[6].mxu0 %vm366_vm7, %v5065_v62  ;;  %v670_v7 = vpop.permute.xlu0 %669 }
 0x3f7   :  { %4315 = vmatpush3.xpose.msk.msra.mxu0 %vm366_vm7, %v518_v5  ;;  %4325 = vmatpush3.xpose.msk.msra.mxu1 %vm366_vm7, %v670_v7 }
 0x3f8   :  { %4316 = vmatprep.mubr.msk.f32.mxu0 %vm4829_vm6, %v4828_v55  ;;  %4319 = vmatprep.subr.mxu0 %v4828_v55 }
 0x3f9   :  { %4334 = vmatprep.subr.mxu1 %v4828_v55 }
 0x3fa   :  { %4317 = vmatmul.mubr.msk.f32.vlgmr.msra.gmra.mrb[8].mxu0 %vm366_vm7, %v5063_v61  ;;  %4327 = vmatmul.mubr.msk.f32.vlgmr.msra.gmra.mrb[0].mxu1 %vm366_vm7, %v5051_v60  ;;  %v822_v8 = vpop.permute.xlu0 %821  ;;  %v746_v11 = vpop.permute.xlu1 %745 }
 0x3fb   :  { %4320 = vmatpush3.xpose.msk.msra.mxu0 %vm366_vm7, %v594_v6  ;;  %4335 = vmatpush3.xpose.msk.msra.mxu1 %vm366_vm7, %v822_v8 }
 0x3fc   :  { %4321 = vmatprep.mubr.msk.f32.mxu0 %vm4829_vm6, %v4828_v55  ;;  %4336 = vmatprep.mubr.msk.f32.mxu1 %vm4829_vm6, %v4828_v55 }
 0x3fd   :  { %4329 = vmatprep.subr.mxu0 %v4828_v55  ;;  %4344 = vmatprep.subr.mxu1 %v4828_v55 }
 0x3fe   :  { %4322 = vmatmul.mubr.msk.f32.vlgmr.msra.gmra.mrb[10].mxu0 %vm366_vm7, %v5071_v63  ;;  %4337 = vmatmul.mubr.msk.f32.vlgmr.msra.gmra.mrb[2].mxu1 %vm366_vm7, %v5073_v0  ;;  %v898_v12 = vpop.permute.xlu1 %897 }
 0x3ff   :  { %4330 = vmatpush3.xpose.msk.msra.mxu0 %vm366_vm7, %v746_v11  ;;  %4331 = vmatprep.mubr.msk.f32.mxu0 %vm4829_vm6, %v4828_v55 }
 0x400   :  { %4339 = vmatprep.subr.mxu0 %v4828_v55  ;;  %4346 = vmatprep.mubr.msk.f32.mxu1 %vm4829_vm6, %v4828_v55 }
 0x402   :  { %4332 = vmatmul.mubr.msk.f32.vlgmr.msra.gmra.mrb[12].mxu0 %vm366_vm7, %v5079_v1 }
 0x403   :  { %4340 = vmatpush3.xpose.msk.msra.mxu0 %vm366_vm7, %v898_v12  ;;  %4341 = vmatprep.mubr.msk.f32.mxu0 %vm4829_vm6, %v4828_v55 }
 0x404   :  { %4349 = vmatprep.subr.mxu0 %v4828_v55 }
 0x406   :  { %4342 = vmatmul.mubr.msk.f32.vlgmr.msra.gmra.mrb[14].mxu0 %vm366_vm7, %v5087_v3 }
 0x407   :  { %4351 = vmatprep.mubr.msk.f32.mxu0 %vm4829_vm6, %v4828_v55 }
 0x45f   :  { %v437_v21 = vpop.f32.mrb[4].mxu0 }
 0x460   :  { %v5150_v22 = vsel %vm5144_vm9, -1e+09, %v437_v21  ;;  %v4308_v23 = vpop.f32.mrb[5].mxu0  ;;  %v986_v21 = vsel %vm978_vm8, 1, %v4834_v17 }
 0x461   :  { %v1037_v24 = vsel %vm366_vm7, %v5150_v22, -inf  ;;  %v988_v23 = vsel %vm980_vm10, 1, %v4834_v17 }
 0x462   :  { %1038 = vmax.xlane.f32.xlu0 %v1037_v24  ;;  %v1020_v24 = vrot.slane %v988_v23, %v5140_v16 }
 0x464   :  { %vm5242_vm12 = vcmp.eq.s32.totalorder %v1020_v24, 1 }
 0x4c9   :  { %v513_v36 = vpop.f32.mrb[6].mxu0 }
 0x4ca   :  { %v1030_v37 = vsel %vm5169_vm13, -1e+09, %v513_v36  ;;  %v4313_v38 = vpop.f32.mrb[7].mxu0 }
 0x4cb   :  { %v1040_v40 = vsel %vm366_vm7, %v1030_v37, -inf }
 0x4cc   :  { %1041 = vmax.xlane.f32.xlu1 %v1040_v40 }
 0x4cd   :  { %v589_v43 = vpop.f32.mrb[8].mxu0  ;;  %v741_v44 = vpop.f32.mrb[0].mxu1 }
 0x4ce   :  { %v5190_v46 = vsel %vm5182_vm15, -1e+09, %v589_v43  ;;  %v4318_v47 = vpop.f32.mrb[9].mxu0  ;;  %v4328_v48 = vpop.f32.mrb[1].mxu1  ;;  %v1033_v5 = vsel %vm5199_vm4, -1e+09, %v741_v44 }
 0x4cf   :  { %v1043_v50 = vsel %vm366_vm7, %v5190_v46, -inf  ;;  %v1049_v11 = vsel %vm366_vm7, %v1033_v5, -inf }
 0x4d0   :  { %1044 = vmax.xlane.f32.xlu0 %v1043_v50 }
 0x4d1   :  { %v665_v53 = vpop.f32.mrb[10].mxu0  ;;  %v893_v54 = vpop.f32.mrb[2].mxu1 }
 0x4d2   :  { %v5206_v57 = vsel %vm5195_vm3, -1e+09, %v665_v53  ;;  %v4323_v58 = vpop.f32.mrb[11].mxu0  ;;  %v4338_v2 = vpop.f32.mrb[3].mxu1  ;;  %v1035_v12 = vsel %vm5212_vm5, -1e+09, %v893_v54 }
 0x4d3   :  { %v1046_v4 = vsel %vm366_vm7, %v5206_v57, -inf  ;;  %v1055_v15 = vsel %vm366_vm7, %v1035_v12, -inf }
 0x4d4   :  { %1047 = vmax.xlane.f32.xlu0 %v1046_v4 }
 0x4d5   :  { %v817_v7 = vpop.f32.mrb[12].mxu0 }
 0x4d6   :  { %v4333_v8 = vpop.f32.mrb[13].mxu0 }
 0x4d8   :  { %1050 = vmax.xlane.f32.xlu0 %v1049_v11 }
 0x4d9   :  { %v969_v13 = vpop.f32.mrb[14].mxu0 }
 0x4da   :  { %v4343_v14 = vpop.f32.mrb[15].mxu0  ;;  %v1036_v27 = vsel %vm5242_vm12, -1e+09, %v969_v13 }
 0x4db   :  { %v1058_v17 = vsel %vm366_vm7, %v1036_v27, -inf }
 0x4dc   :  { %1056 = vmax.xlane.f32.xlu0 %v1055_v15 }
 0x4dd   :  { %1201 = vrot.lane.b32.xlu1 %v5065_v62, %s5798_s1  ;;  %v1012_v62 = vrot.slane %v986_v21, %v5140_v16 }
 0x4df   :  { %vm5235_vm11 = vcmp.eq.s32.totalorder %v1012_v62, 1 }
 0x4e1   :  { %1277 = vrot.lane.b32.xlu1 %v5063_v61, %s5798_s1 }
 0x4ef   :  { %v1039_v16 = vpop.xlane.xlu0 %1038 }
 0x4f0   :  { %v1061_v35 = vsub.f32 %v5150_v22, %v1039_v16 }
 0x4f2   :  { %1125 = vrot.lane.b32.xlu0 %v5045_v59, %s5798_s1  ;;  %v1034_v59 = vsel %vm5235_vm11, -1e+09, %v817_v7  ;;  %v1069_v40 = vmul.f32 1.442695, %v1061_v35 }
 0x4f3   :  { %v1052_v26 = vsel %vm366_vm7, %v1034_v59, -inf }
 0x505   :  { %1053 = vmax.xlane.f32.xlu1 %v1052_v26 }
 0x509   :  { %1059 = vmax.xlane.f32.xlu1 %v1058_v17 }
 0x51a   :  { %1353 = vrot.lane.b32.xlu1 %v5071_v63, %s5798_s1 }
 0x559   :  { %v1042_v28 = vpop.xlane.xlu1 %1041 }
 0x55a   :  { %v1062_v29 = vsub.f32 %v1030_v37, %v1042_v28 }
 0x55c   :  { %v1071_v30 = vmul.f32 1.442695, %v1062_v29 }
 0x55d   :  { %v1202_v31 = vpop.permute.xlu1 %1201  ;;  %v1045_v33 = vpop.xlane.xlu0 %1044 }
 0x55e   :  { %4724 = vpow2.f32 %v1071_v30  ;;  %4350 = vmatpush3.msra.mxu0 %v1202_v31  ;;  %v1063_v44 = vsub.f32 %v5190_v46, %v1045_v33 }
 0x55f   :  { %4359 = vmatprep.subr.mxu0 %v4828_v55 }
 0x560   :  { %v1073_v22 = vmul.f32 1.442695, %v1063_v44 }
 0x561   :  { %v1048_v34 = vpop.xlane.xlu0 %1047 }
 0x562   :  { %v1064_v2 = vsub.f32 %v5206_v57, %v1048_v34 }
 0x564   :  { %v1075_v4 = vmul.f32 1.442695, %v1064_v2 }
 0x565   :  { %v1051_v36 = vpop.xlane.xlu0 %1050 }
 0x566   :  { %v1065_v38 = vsub.f32 %v1033_v5, %v1051_v36  ;;  %v1278_v5 = vpop.permute.xlu1 %1277 }
 0x568   :  { %v4725_v39 = vpop.eup %4724  ;;  %v1077_v42 = vmul.f32 1.442695, %v1065_v38 }
 0x569   :  { %v1057_v43 = vpop.xlane.xlu0 %1056  ;;  %v1088_v63 = vsel %vm366_vm7, %v4725_v39, 0.0 }
 0x56a   :  { %4726 = vpow2.f32 %v1077_v42  ;;  %v1067_v37 = vsub.f32 %v1035_v12, %v1057_v43  ;;  %1089 = vadd.xlane.f32.xlu1 %v1088_v63 }
 0x56b   :  { %4728 = vpow2.f32 %v1069_v40 }
 0x56c   :  { %v1081_v45 = vmul.f32 1.442695, %v1067_v37 }
 0x56d   :  { %v1126_v47 = vpop.permute.xlu0 %1125 }
 0x56e   :  { %4345 = vmatpush3.msra.mxu1 %v1126_v47  ;;  %4730 = vpow2.f32 %v1081_v45 }
 0x56f   :  { %4354 = vmatprep.subr.mxu1 %v4828_v55  ;;  %4732 = vpow2.f32 %v1073_v22 }
 0x570   :  { %4734 = vpow2.f32 %v1075_v4  ;;  %v258_v4 = vld [vmem:[%s5840_s0] sm:$0xff] }
 0x574   :  { %v5257_v48 = vpop.eup %4726 }
 0x575   :  { %v1097_v49 = vsel %vm366_vm7, %v5257_v48, 0.0  ;;  %v4729_v50 = vpop.eup %4728 }
 0x576   :  { %1098 = vadd.xlane.f32.xlu0 %v1097_v49  ;;  %v1085_v53 = vsel %vm366_vm7, %v4729_v50, 0.0 }
 0x578   :  { %v5262_v54 = vpop.eup %4730 }
 0x579   :  { %v1103_v46 = vsel %vm366_vm7, %v5262_v54, 0.0  ;;  %v4733_v56 = vpop.eup %4732 }
 0x57a   :  { %1086 = vadd.xlane.f32.xlu0 %v1085_v53  ;;  %v1091_v58 = vsel %vm366_vm7, %v4733_v56, 0.0  ;;  %v4735_v14 = vpop.eup %4734 }
 0x57b   :  { %1505 = vrot.lane.b32.xlu1 %v5079_v1, %s5798_s1  ;;  %v1094_v57 = vsel %vm366_vm7, %v4735_v14, 0.0 }
 0x57e   :  { %1104 = vadd.xlane.f32.xlu0 %v1103_v46 }
 0x582   :  { %1092 = vadd.xlane.f32.xlu0 %v1091_v58 }
 0x592   :  { %v1054_v7 = vpop.xlane.xlu1 %1053 }
 0x593   :  { %v1066_v8 = vsub.f32 %v1034_v59, %v1054_v7 }
 0x595   :  { %v1079_v11 = vmul.f32 1.442695, %v1066_v8  ;;  %v260_v8 = vld [vmem:[%s5840_s0 + $0x10] sm:$0xff] }
 0x596   :  { %v1060_v12 = vpop.xlane.xlu1 %1059 }
 0x597   :  { %4736 = vpow2.f32 %v1079_v11  ;;  %v1068_v13 = vsub.f32 %v1036_v27, %v1060_v12  ;;  %v261_v11 = vld [vmem:[%s5840_s0 + $0x18] sm:$0xff] }
 0x598   :  { %1429 = vrot.lane.b32.xlu0 %v5051_v60, %s5798_s1  ;;  %v4605_v12 = vpack.c.bf16 %v261_v11, %v260_v8 }
 0x599   :  { %v1083_v1 = vmul.f32 1.442695, %v1068_v13 }
 0x59a   :  { %v1354_v60 = vpop.permute.xlu1 %1353 }
 0x59b   :  { %4738 = vpow2.f32 %v1083_v1 }
 0x59c   :  { %1581 = vrot.lane.b32.xlu0 %v5073_v0, %s5798_s1 }
 0x59f   :  { %1095 = vadd.xlane.f32.xlu1 %v1094_v57 }
 0x5a1   :  { %v4737_v15 = vpop.eup %4736 }
 0x5a2   :  { %v1100_v18 = vsel %vm366_vm7, %v4737_v15, 0.0 }
 0x5a3   :  { %1101 = vadd.xlane.f32.xlu1 %v1100_v18 }
 0x5a5   :  { %v5276_v19 = vpop.eup %4738 }
 0x5a6   :  { %v1106_v21 = vsel %vm366_vm7, %v5276_v19, 0.0 }
 0x5a7   :  { %1107 = vadd.xlane.f32.xlu1 %v1106_v21 }
 0x5b8   :  { %1657 = vrot.lane.b32.xlu1 %v5087_v3, %s5798_s1  ;;  %s5846_s1 = smov 24  }
 0x5f7   :  { %v1090_v62 = vpop.xlane.xlu1 %1089 }
 0x5f8   :  { %4740 = vrcp.f32 %v1090_v62 }
 0x5fb   :  { %v1506_v36 = vpop.permute.xlu1 %1505 }
 0x602   :  { %v4741_v0 = vpop.eup %4740 }
 0x603   :  { %v1118_v23 = vmul.f32 %v4741_v0, %v4725_v39  ;;  %v1099_v24 = vpop.xlane.xlu0 %1098 }
 0x605   :  { %4352 = vmatmul.mubr.msk.f32.vlgmr.msra.gmra.mrb[16].mxu0 %vm366_vm7, %v1118_v23 }
 0x606   :  { %4360 = vmatpush3.msra.mxu0 %v1354_v60  ;;  %4361 = vmatprep.mubr.msk.f32.mxu0 %vm4829_vm6, %v4828_v55 }
 0x607   :  { %v1087_v59 = vpop.xlane.xlu0 %1086  ;;  %4369 = vmatprep.subr.mxu0 %v4828_v55 }
 0x608   :  { %4742 = vrcp.f32 %v1087_v59 }
 0x60b   :  { %v1105_v26 = vpop.xlane.xlu0 %1104 }
 0x60f   :  { %v1093_v27 = vpop.xlane.xlu0 %1092 }
 0x610   :  { %4744 = vrcp.f32 %v1093_v27 }
 0x611   :  { %4746 = vrcp.f32 %v1099_v24 }
 0x612   :  { %v4743_v3 = vpop.eup %4742  ;;  %4748 = vrcp.f32 %v1105_v26 }
 0x613   :  { %v1117_v17 = vmul.f32 %v4743_v3, %v4729_v50  ;;  %v1430_v29 = vpop.permute.xlu0 %1429 }
 0x615   :  { %4347 = vmatmul.mubr.msk.f32.vlgmr.msra.gmra.mrb[4].mxu1 %vm366_vm7, %v1117_v17 }
 0x616   :  { %4355 = vmatpush3.msra.mxu1 %v1278_v5  ;;  %4356 = vmatprep.mubr.msk.f32.mxu1 %vm4829_vm6, %v4828_v55  ;;  %v259_v5 = vld [vmem:[%s5840_s0 + $0x8] sm:$0xff]  ;;  %s5841_s0 = sld [smem:[#allocation12_spill]] }
 0x617   :  { %4364 = vmatprep.subr.mxu1 %v4828_v55  ;;  %v1582_v34 = vpop.permute.xlu0 %1581  ;;  %v4601_v7 = vpack.c.bf16 %v259_v5, %v258_v4 }
 0x61a   :  { %v4745_v16 = vpop.eup %4744 }
 0x61b   :  { %v1119_v28 = vmul.f32 %v4745_v16, %v4733_v56  ;;  %v4747_v30 = vpop.eup %4746 }
 0x61c   :  { %v1121_v31 = vmul.f32 %v4747_v30, %v5257_v48  ;;  %v4749_v33 = vpop.eup %4748  ;;  %v4091_v16 = vld [vmem:[%s5841_s0] ss:$0 sm:$0xff] }
 0x61d   :  { %4357 = vmatmul.mubr.msk.f32.vlgmr.msra.gmra.mrb[6].mxu1 %vm366_vm7, %v1119_v28  ;;  %v1123_v35 = vmul.f32 %v4749_v33, %v5262_v54 }
 0x61e   :  { %4365 = vmatpush3.msra.mxu1 %v1430_v29  ;;  %4366 = vmatprep.mubr.msk.f32.mxu1 %vm4829_vm6, %v4828_v55 }
 0x61f   :  { %4374 = vmatprep.subr.mxu1 %v4828_v55 }
 0x621   :  { %4367 = vmatmul.mubr.msk.f32.vlgmr.msra.gmra.mrb[8].mxu1 %vm366_vm7, %v1121_v31 }
 0x622   :  { %4375 = vmatpush3.msra.mxu1 %v1582_v34  ;;  %4376 = vmatprep.mubr.msk.f32.mxu1 %vm4829_vm6, %v4828_v55 }
 0x623   :  { %4602 = vmatprep.subr.bf16.mxu1 %v4601_v7 }
 0x625   :  { %4377 = vmatmul.mubr.msk.f32.vlgmr.msra.gmra.mrb[10].mxu1 %vm366_vm7, %v1123_v35 }
 0x626   :  { %4604 = vmatpush3.bf16.msra.mxu1 %v4601_v7 }
 0x627   :  { %4606 = vmatprep.subr.bf16.mxu1 %v4605_v12 }
 0x62a   :  { %4608 = vmatpush3.bf16.msra.mxu1 %v4605_v12 }
 0x62c   :  { %v1096_v38 = vpop.xlane.xlu1 %1095 }
 0x62d   :  { %4750 = vrcp.f32 %v1096_v38 }
 0x630   :  { %v1102_v39 = vpop.xlane.xlu1 %1101 }
 0x631   :  { %4752 = vrcp.f32 %v1102_v39 }
 0x634   :  { %v1108_v40 = vpop.xlane.xlu1 %1107 }
 0x635   :  { %4754 = vrcp.f32 %v1108_v40 }
 0x637   :  { %v4751_v42 = vpop.eup %4750 }
 0x638   :  { %v1120_v43 = vmul.f32 %v4751_v42, %v4735_v14  ;;  %v1658_v44 = vpop.permute.xlu1 %1657 }
 0x63a   :  { %4362 = vmatmul.mubr.msk.f32.vlgmr.msra.gmra.mrb[18].mxu0 %vm366_vm7, %v1120_v43 }
 0x63b   :  { %v4753_v63 = vpop.eup %4752  ;;  %4370 = vmatpush3.msra.mxu0 %v1506_v36  ;;  %4371 = vmatprep.mubr.msk.f32.mxu0 %vm4829_vm6, %v4828_v55 }
 0x63c   :  { %v1122_v37 = vmul.f32 %v4753_v63, %v4737_v15  ;;  %4379 = vmatprep.subr.mxu0 %v4828_v55 }
 0x63e   :  { %4372 = vmatmul.mubr.msk.f32.vlgmr.msra.gmra.mrb[20].mxu0 %vm366_vm7, %v1122_v37 }
 0x63f   :  { %v4755_v45 = vpop.eup %4754  ;;  %4380 = vmatpush3.msra.mxu0 %v1658_v44  ;;  %4381 = vmatprep.mubr.msk.f32.mxu0 %vm4829_vm6, %v4828_v55 }
 0x640   :  { %v1124_v47 = vmul.f32 %v4755_v45, %v5276_v19  ;;  %v1909_v45 = vld [vmem:[%s5842_s11] sm:$0xff] }
 0x642   :  { %4382 = vmatmul.mubr.msk.f32.vlgmr.msra.gmra.mrb[22].mxu0 %vm366_vm7, %v1124_v47  ;;  %v1910_v47 = vld [vmem:[%s5842_s11 + $0x8] sm:$0xff] }
 0x6d8   :  { %v1273_v22 = vpop.f32.mrb[16].mxu0 }
 0x6d9   :  { %v4353_v48 = vpop.f32.mrb[17].mxu0  ;;  %1734 = vrot.lane.b32.xlu0 %v1273_v22, %s4836_s29  ;;  %v1911_v22 = vld [vmem:[%s5842_s11 + $0x10] sm:$0xff] }
 0x6da   :  { %v4609_v48 = vpack.c.bf16 %v1910_v47, %v1909_v45  ;;  %v2069_v45 = vld [vmem:[%s5775_s14 + $0x70] sm:$0xff]  ;;  %v2070_v47 = vld [vmem:[%s5775_s14 + $0x78] sm:$0xff] }
 0x6dc   :  { %4610 = vmatprep.subr.bf16.mxu0 %v4609_v48 }
 0x6dd   :  { %4612 = vmatpush3.bf16.msra.mxu0 %v4609_v48  ;;  %v4096_v48 = vld [vmem:[%s5776_s13] ss:$0 sm:$0xff] }
 0x6e8   :  { %v1197_v49 = vpop.f32.mrb[4].mxu1 }
 0x6e9   :  { %v4348_v50 = vpop.f32.mrb[5].mxu1 }
 0x6f0   :  { %v1349_v53 = vpop.f32.mrb[6].mxu1 }
 0x6f1   :  { %1738 = vrot.lane.b32.xlu1 %v1349_v53, %s4837_s7  ;;  %v4358_v54 = vpop.f32.mrb[7].mxu1 }
 0x6f4   :  { %v1501_v46 = vpop.f32.mrb[8].mxu1 }
 0x6f5   :  { %v4368_v56 = vpop.f32.mrb[9].mxu1 }
 0x6f8   :  { %v1653_v58 = vpop.f32.mrb[10].mxu1 }
 0x6f9   :  { %v4378_v2 = vpop.f32.mrb[11].mxu1 }
 0x70d   :  { %v1425_v13 = vpop.f32.mrb[18].mxu0 }
 0x70e   :  { %v4363_v1 = vpop.f32.mrb[19].mxu0  ;;  %1742 = vrot.lane.b32.xlu1 %v1425_v13, %s5800_s8 }
 0x711   :  { %v1577_v14 = vpop.f32.mrb[20].mxu0 }
 0x712   :  { %v4373_v57 = vpop.f32.mrb[21].mxu0  ;;  %1750 = vrot.lane.b32.xlu0 %v1577_v14, %s4836_s29 }
 0x715   :  { %v1729_v15 = vpop.f32.mrb[22].mxu0 }
 0x716   :  { %v4383_v18 = vpop.f32.mrb[23].mxu0  ;;  %1758 = vrot.lane.b32.xlu1 %v1729_v15, %s5800_s8  ;;  %1754 = vrot.lane.b32.xlu0 %v1653_v58, %s4837_s7 }
 0x717   :  { %v4094_v18 = vld [vmem:[%s5843_s3] ss:$0 sm:$0xff] }
 0x74b   :  { %v1735_v19 = vpop.permute.xlu0 %1734 }
 0x74c   :  { %v1745_v60 = vsel %vm366_vm7, %v1197_v49, %v1735_v19  ;;  %v1912_v49 = vld [vmem:[%s5842_s11 + $0x18] sm:$0xff] }
 0x74d   :  { %v4613_v50 = vpack.c.bf16 %v1912_v49, %v1911_v22  ;;  %v4645_v22 = vpack.c.bf16 %v2070_v47, %v2069_v45 }
 0x74f   :  { %4614 = vmatprep.subr.bf16.mxu0 %v4613_v50 }
 0x750   :  { %4616 = vmatpush3.bf16.msra.mxu0 %v4613_v50 }
 0x763   :  { %v1739_v21 = vpop.permute.xlu1 %1738 }
 0x764   :  { %v1746_v62 = vsel %vm113_vm0, %v1745_v60, %v1739_v21  ;;  %v4095_v21 = vld [vmem:[%s5844_s2] ss:$0 sm:$0xff] }
 0x780   :  { %v1743_v0 = vpop.permute.xlu1 %1742 }
 0x781   :  { %v1748_v23 = vsel %vm5802_vm14, %v1746_v62, %v1743_v0 }
 0x782   :  { %4392 = vmatprep.mubr.msk.f32.mxu1 %vm195_vm1, %v1748_v23 }
 0x784   :  { %v1751_v24 = vpop.permute.xlu0 %1750 }
 0x785   :  { %v1761_v59 = vsel %vm366_vm7, %v1501_v46, %v1751_v24 }
 0x788   :  { %v1759_v26 = vpop.permute.xlu1 %1758  ;;  %v1755_v27 = vpop.permute.xlu0 %1754 }
 0x789   :  { %v1762_v3 = vsel %vm113_vm0, %v1761_v59, %v1755_v27  ;;  %v2056_v27 = vld [vmem:[%s5775_s14 + $0x8] sm:$0xff] }
 0x78a   :  { %v1763_v17 = vsel %vm5802_vm14, %v1762_v3, %v1759_v26  ;;  %v2055_v26 = vld [vmem:[%s5775_s14] sm:$0xff] }
 0x78b   :  { %4393 = vmatmul.mubr.msk.f32.vlgmr.msra.gmra.mrb[12].mxu1 %vm195_vm1, %v1763_v17  ;;  %v4617_v3 = vpack.c.bf16 %v2056_v27, %v2055_v26  ;;  %v2057_v17 = vld [vmem:[%s5775_s14 + $0x10] sm:$0xff] }
 0x78d   :  { %4618 = vmatprep.subr.bf16.mxu1 %v4617_v3 }
 0x78e   :  { %4620 = vmatpush3.bf16.msra.mxu1 %v4617_v3 }
 0x85e   :  { %v4394_v28 = vpop.f32.mrb[12].mxu1 }
 0x85f   :  { %v1848_v29 = vadd.f32 %v4394_v28, %v4091_v16  ;;  %v1842_v30 = vpop.f32.mrb[13].mxu1 }
 0x860   :  { %v1843_v31 = vadd.f32 %v4091_v16, %v1842_v30  ;;  %v2058_v16 = vld [vmem:[%s5775_s14 + $0x18] sm:$0xff]  ;;  %v2060_v30 = vld [vmem:[%s5775_s14 + $0x28] sm:$0xff] }
 0x861   :  { %v5339_v33 = vadd.f32 %v1848_v29, %v5006_v10  ;;  %v4621_v28 = vpack.c.bf16 %v2058_v16, %v2057_v17  ;;  %v2059_v29 = vld [vmem:[%s5775_s14 + $0x20] sm:$0xff] }
 0x862   :  { %v5342_v34 = vadd.f32 %v1843_v31, %v5004_v9  ;;  %v4625_v31 = vpack.c.bf16 %v2060_v30, %v2059_v29 }
 0x863   :  { %v1856_v35 = vsel %vm195_vm1, %v5339_v33, 0.0  ;;  %4622 = vmatprep.subr.bf16.mxu1 %v4621_v28 }
 0x864   :  { %1857 = vadd.xlane.f32.xlu1 %v1856_v35  ;;  %v1853_v36 = vsel %vm195_vm1, %v5342_v34, 0.0  ;;  %4624 = vmatpush3.bf16.msra.mxu1 %v4621_v28  ;;  %v2061_v35 = vld [vmem:[%s5775_s14 + $0x30] sm:$0xff] }
 0x865   :  { %1854 = vadd.xlane.f32.xlu0 %v1853_v36  ;;  %4626 = vmatprep.subr.bf16.mxu1 %v4625_v31  ;;  %v2062_v36 = vld [vmem:[%s5775_s14 + $0x38] sm:$0xff] }
 0x868   :  { %4628 = vmatpush3.bf16.msra.mxu1 %v4625_v31 }
 0x8f1   :  { %v1858_v38 = vpop.xlane.xlu1 %1857 }
 0x8f2   :  { %v1860_v39 = vmul.f32 0.03125, %v1858_v38  ;;  %v1855_v40 = vpop.xlane.xlu0 %1854  ;;  %v4629_v38 = vpack.c.bf16 %v2062_v36, %v2061_v35 }
 0x8f3   :  { %v1859_v42 = vmul.f32 0.03125, %v1855_v40  ;;  %v2064_v40 = vld [vmem:[%s5775_s14 + $0x48] sm:$0xff] }
 0x8f4   :  { %v1862_v43 = vsub.f32 %v5339_v33, %v1860_v39  ;;  %4630 = vmatprep.subr.bf16.mxu1 %v4629_v38  ;;  %v2063_v39 = vld [vmem:[%s5775_s14 + $0x40] sm:$0xff] }
 0x8f5   :  { %v1861_v10 = vsub.f32 %v5342_v34, %v1859_v42  ;;  %4632 = vmatpush3.bf16.msra.mxu1 %v4629_v38  ;;  %v4633_v42 = vpack.c.bf16 %v2064_v40, %v2063_v39 }
 0x8f6   :  { %v1864_v37 = vmul.f32 %v1862_v43, %v1862_v43 }
 0x8f7   :  { %v1863_v63 = vmul.f32 %v1861_v10, %v1861_v10  ;;  %4634 = vmatprep.subr.bf16.mxu1 %v4633_v42 }
 0x8f8   :  { %v1868_v44 = vsel %vm195_vm1, %v1864_v37, 0.0  ;;  %v2068_v37 = vld [vmem:[%s5775_s14 + $0x68] sm:$0xff] }
 0x8f9   :  { %v1865_v9 = vsel %vm195_vm1, %v1863_v63, 0.0  ;;  %4636 = vmatpush3.bf16.msra.mxu1 %v4633_v42 }
 0x8fa   :  { %1866 = vadd.xlane.f32.xlu0 %v1865_v9  ;;  %v2067_v9 = vld [vmem:[%s5775_s14 + $0x60] sm:$0xff] }
 0x8fe   :  { %1869 = vadd.xlane.f32.xlu0 %v1868_v44  ;;  %v4641_v44 = vpack.c.bf16 %v2068_v37, %v2067_v9 }
 0x987   :  { %v1867_v53 = vpop.xlane.xlu0 %1866 }
 0x988   :  { %v1871_v54 = vmul.f32 0.032258064, %v1867_v53 }
 0x98a   :  { %4756 = vrsqrt.f32 %v1871_v54  ;;  %vm1875_vm2 = vcmp.eq.f32.partialorder %v1871_v54, inf  ;;  %v1878_v4 = vand.u32 2147483648, %v1871_v54  ;;  %vm1877_vm8 = vcmp.eq.f32.partialorder %v1871_v54, 0.0 }
 0x98b   :  { %v1870_v46 = vpop.xlane.xlu0 %1869 }
 0x98c   :  { %v1872_v56 = vmul.f32 0.032258064, %v1870_v46 }
 0x98e   :  { %4758 = vrsqrt.f32 %v1872_v56  ;;  %vm1882_vm10 = vcmp.eq.f32.partialorder %v1872_v56, inf  ;;  %v1885_v13 = vand.u32 2147483648, %v1872_v56  ;;  %vm1884_vm14 = vcmp.eq.f32.partialorder %v1872_v56, 0.0 }
 0x994   :  { %v4757_v58 = vpop.eup %4756 }
 0x995   :  { %v1874_v2 = vmul.f32 %v4757_v58, %v1871_v54 }
 0x997   :  { %v1876_v5 = vsel %vm1875_vm2, %v1871_v54, %v1874_v2 }
 0x998   :  { %v4759_v7 = vpop.eup %4758  ;;  %v1879_v8 = vsel %vm1877_vm8, %v1878_v4, %v1876_v5 }
 0x999   :  { %v1887_v11 = vadd.f32 1e-06, %v1879_v8  ;;  %v1881_v12 = vmul.f32 %v4759_v7, %v1872_v56 }
 0x99b   :  { %4760 = vrcp.f32 %v1887_v11  ;;  %v1883_v1 = vsel %vm1882_vm10, %v1872_v56, %v1881_v12 }
 0x99c   :  { %v1886_v14 = vsel %vm1884_vm14, %v1885_v13, %v1883_v1 }
 0x99d   :  { %v1888_v57 = vadd.f32 1e-06, %v1886_v14 }
 0x99f   :  { %4762 = vrcp.f32 %v1888_v57 }
 0x9a5   :  { %v4761_v15 = vpop.eup %4760 }
 0x9a6   :  { %v1890_v19 = vmul.f32 %v4761_v15, %v1861_v10  ;;  %v2066_v10 = vld [vmem:[%s5775_s14 + $0x58] sm:$0xff] }
 0x9a8   :  { %v1899_v60 = vmul.f32 %v4094_v18, %v1890_v19 }
 0x9a9   :  { %v4763_v62 = vpop.eup %4762 }
 0x9aa   :  { %v1892_v0 = vmul.f32 %v4763_v62, %v1862_v43  ;;  %v1907_v23 = vadd.f32 %v4095_v21, %v1899_v60  ;;  %v2065_v43 = vld [vmem:[%s5775_s14 + $0x50] sm:$0xff] }
 0x9ab   :  { %v4637_v63 = vpack.c.bf16 %v2066_v10, %v2065_v43 }
 0x9ac   :  { %v1900_v24 = vmul.f32 %v4094_v18, %v1892_v0  ;;  %4403 = vmatprep.mubr.msk.f32.mxu0 %vm195_vm1, %v1907_v23 }
 0x9ad   :  { %4638 = vmatprep.subr.bf16.mxu1 %v4637_v63 }
 0x9ae   :  { %v1908_v59 = vadd.f32 %v4095_v21, %v1900_v24  ;;  %4640 = vmatpush3.bf16.msra.mxu1 %v4637_v63 }
 0x9af   :  { %4642 = vmatprep.subr.bf16.mxu1 %v4641_v44 }
 0x9b0   :  { %4404 = vmatmul.mubr.msk.f32.vlgmr.msra.gmra.mrb[24].mxu0 %vm195_vm1, %v1908_v59 }
 0x9b2   :  { %4644 = vmatpush3.bf16.msra.mxu1 %v4641_v44 }
 0x9b3   :  { %4646 = vmatprep.subr.bf16.mxu1 %v4645_v22 }
 0x9b6   :  { %4648 = vmatpush3.bf16.msra.mxu1 %v4645_v22 }
 0x9b7   :  { %4482 = vmatprep.subr.mxu1 %v4828_v55 }
 0xa83   :  { %v4405_v49 = vpop.f32.mrb[24].mxu0 }
 0xa84   :  { %v1998_v50 = vadd.f32 %v4405_v49, %v4096_v48  ;;  %v1992_v53 = vpop.f32.mrb[25].mxu0 }
 0xa85   :  { %v1993_v54 = vadd.f32 %v4096_v48, %v1992_v53  ;;  %v4103_v53 = vld [vmem:[%s5777_s15] ss:$0 sm:$0xff] }
 0xa86   :  { %v2002_v46 = vmul.f32 0.70710677, %v1998_v50  ;;  %v2050_v22 = vmul.f32 0.5, %v1998_v50 }
 0xa87   :  { %v2001_v56 = vmul.f32 0.70710677, %v1993_v54  ;;  %v2049_v45 = vmul.f32 0.5, %v1993_v54 }
 0xa88   :  { %v2004_v58 = vand.u32 2147483647, %v2002_v46  ;;  %vm2044_vm14 = vcmp.ge.f32.partialorder %v2002_v46, 0.0 }
 0xa89   :  { %v2003_v2 = vand.u32 2147483647, %v2001_v56  ;;  %vm2043_vm2 = vcmp.ge.f32.partialorder %v2001_v56, 0.0 }
 0xa8a   :  { %v2006_v4 = vmul.f32 0.3275911, %v2004_v58  ;;  %v2032_v11 = vsub.f32 0.0, %v2004_v58 }
 0xa8b   :  { %v2005_v5 = vmul.f32 0.3275911, %v2003_v2  ;;  %v2031_v12 = vsub.f32 0.0, %v2003_v2 }
 0xa8c   :  { %v2008_v7 = vadd.f32 1.0, %v2006_v4  ;;  %v2034_v1 = vmul.f32 %v2032_v11, %v2004_v58 }
 0xa8d   :  { %v2007_v8 = vadd.f32 1.0, %v2005_v5  ;;  %v2033_v15 = vmul.f32 %v2031_v12, %v2003_v2 }
 0xa8e   :  { %4764 = vrcp.f32 %v2008_v7  ;;  %v2037_v21 = vmul.f32 1.442695, %v2034_v1 }
 0xa8f   :  { %4766 = vrcp.f32 %v2007_v8  ;;  %v2035_v0 = vmul.f32 1.442695, %v2033_v15  ;;  %v2211_v15 = vld [vmem:[%s5778_s20] sm:$0xff] }
 0xa90   :  { %4768 = vpow2.f32 %v2037_v21 }
 0xa91   :  { %4770 = vpow2.f32 %v2035_v0 }
 0xa98   :  { %v4765_v13 = vpop.eup %4764 }
 0xa99   :  { %v4767_v14 = vpop.eup %4766  ;;  %v2014_v57 = vmul.f32 1.0614054, %v4765_v13 }
 0xa9a   :  { %v2013_v18 = vmul.f32 1.0614054, %v4767_v14  ;;  %v4769_v35 = vpop.eup %4768 }
 0xa9b   :  { %v4100_v19 = vadd.f32 -1.4531521, %v2014_v57  ;;  %v4771_v38 = vpop.eup %4770 }
 0xa9c   :  { %v4099_v60 = vadd.f32 -1.4531521, %v2013_v18  ;;  %v2212_v18 = vld [vmem:[%s5778_s20 + $0x8] sm:$0xff] }
 0xa9d   :  { %v2018_v62 = vmul.f32 %v4765_v13, %v4100_v19  ;;  %v2213_v19 = vld [vmem:[%s5778_s20 + $0x10] sm:$0xff]  ;;  %v4649_v21 = vpack.c.bf16 %v2212_v18, %v2211_v15 }
 0xa9e   :  { %v2017_v23 = vmul.f32 %v4767_v14, %v4099_v60  ;;  %v2214_v60 = vld [vmem:[%s5778_s20 + $0x18] sm:$0xff] }
 0xa9f   :  { %v2020_v24 = vadd.f32 1.4214138, %v2018_v62  ;;  %v4653_v62 = vpack.c.bf16 %v2214_v60, %v2213_v19  ;;  %4650 = vmatprep.subr.bf16.mxu0 %v4649_v21 }
 0xaa0   :  { %v2019_v59 = vadd.f32 1.4214138, %v2017_v23  ;;  %4652 = vmatpush3.bf16.msra.mxu0 %v4649_v21 }
 0xaa1   :  { %v2022_v26 = vmul.f32 %v4765_v13, %v2020_v24  ;;  %4654 = vmatprep.subr.bf16.mxu0 %v4653_v62 }
 0xaa2   :  { %v2021_v27 = vmul.f32 %v4767_v14, %v2019_v59 }
 0xaa3   :  { %v4102_v3 = vadd.f32 -0.28449672, %v2022_v26 }
 0xaa4   :  { %v4101_v17 = vadd.f32 -0.28449672, %v2021_v27  ;;  %4656 = vmatpush3.bf16.msra.mxu0 %v4653_v62 }
 0xaa5   :  { %v2026_v16 = vmul.f32 %v4765_v13, %v4102_v3  ;;  %4452 = vmatprep.subr.mxu0 %v4828_v55 }
 0xaa6   :  { %v2025_v28 = vmul.f32 %v4767_v14, %v4101_v17 }
 0xaa7   :  { %v2028_v29 = vadd.f32 0.2548296, %v2026_v16 }
 0xaa8   :  { %v2027_v30 = vadd.f32 0.2548296, %v2025_v28 }
 0xaa9   :  { %v2030_v31 = vmul.f32 %v4765_v13, %v2028_v29 }
 0xaaa   :  { %v2029_v36 = vmul.f32 %v4767_v14, %v2027_v30 }
 0xaab   :  { %v2040_v39 = vmul.f32 %v4769_v35, %v2030_v31 }
 0xaac   :  { %v2039_v40 = vmul.f32 %v4771_v38, %v2029_v36 }
 0xaad   :  { %v2042_v42 = vsub.f32 1.0, %v2040_v39 }
 0xaae   :  { %v2041_v43 = vsub.f32 1.0, %v2039_v40  ;;  %v4104_v40 = vld [vmem:[%s5779_s16] ss:$0 sm:$0xff] }
 0xaaf   :  { %v2046_v10 = vsub.f32 0.0, %v2042_v42 }
 0xab0   :  { %v2045_v63 = vsub.f32 0.0, %v2041_v43 }
 0xab1   :  { %v2048_v9 = vsel %vm2044_vm14, %v2042_v42, %v2046_v10 }
 0xab2   :  { %v2052_v37 = vadd.f32 1.0, %v2048_v9  ;;  %v2047_v44 = vsel %vm2043_vm2, %v2041_v43, %v2045_v63  ;;  %v4105_v63 = vld [vmem:[%s5780_s17] ss:$0 sm:$0xff]  ;;  %s5845_s17 = smov 64  }
 0xab3   :  { %v2051_v47 = vadd.f32 1.0, %v2047_v44 }
 0xab4   :  { %v2054_v49 = vmul.f32 %v2052_v37, %v2050_v22 }
 0xab5   :  { %v2053_v48 = vmul.f32 %v2051_v47, %v2049_v45  ;;  %v4106_v47 = vld [vmem:[%s5781_s21] ss:$0 sm:$0xff] }
 0xab7   :  { %4438 = vmatprep.mubr.f32.mxu1 %v2053_v48 }
 0xab8   :  { %4439 = vmatmul.mubr.f32.vlgmr.msra.gmra.mrb[14].mxu1 %v2054_v49 }
 0xab9   :  { %4484 = vmatprep.mubr.msk.f32.mxu1 %vm4829_vm6, %v4828_v55 }
 0xb8b   :  { %v4440_v46 = vpop.f32.mrb[14].mxu1 }
 0xb8c   :  { %v2150_v58 = vadd.f32 %v4440_v46, %v4103_v53  ;;  %v2144_v2 = vpop.f32.mrb[15].mxu1 }
 0xb8d   :  { %v2145_v56 = vadd.f32 %v4103_v53, %v2144_v2 }
 0xb8e   :  { %v5430_v4 = vadd.f32 %v2150_v58, %v5339_v33 }
 0xb8f   :  { %v5433_v50 = vadd.f32 %v2145_v56, %v5342_v34 }
 0xb90   :  { %v2158_v54 = vsel %vm195_vm1, %v5430_v4, 0.0 }
 0xb91   :  { %2159 = vadd.xlane.f32.xlu1 %v2158_v54  ;;  %v2155_v5 = vsel %vm195_vm1, %v5433_v50, 0.0 }
 0xb92   :  { %2156 = vadd.xlane.f32.xlu0 %v2155_v5 }
 0xc1e   :  { %v2160_v7 = vpop.xlane.xlu1 %2159 }
 0xc1f   :  { %v2162_v8 = vmul.f32 0.03125, %v2160_v7  ;;  %v2157_v11 = vpop.xlane.xlu0 %2156 }
 0xc20   :  { %v2161_v12 = vmul.f32 0.03125, %v2157_v11 }
 0xc21   :  { %v2164_v13 = vsub.f32 %v5430_v4, %v2162_v8 }
 0xc22   :  { %v2163_v33 = vsub.f32 %v5433_v50, %v2161_v12 }
 0xc23   :  { %v2166_v1 = vmul.f32 %v2164_v13, %v2164_v13 }
 0xc24   :  { %v2165_v14 = vmul.f32 %v2163_v33, %v2163_v33 }
 0xc25   :  { %v2170_v34 = vsel %vm195_vm1, %v2166_v1, 0.0 }
 0xc26   :  { %2171 = vadd.xlane.f32.xlu1 %v2170_v34  ;;  %v2167_v57 = vsel %vm195_vm1, %v2165_v14, 0.0 }
 0xc27   :  { %2168 = vadd.xlane.f32.xlu0 %v2167_v57 }
 0xcb3   :  { %v2172_v0 = vpop.xlane.xlu1 %2171 }
 0xcb4   :  { %v2174_v23 = vmul.f32 0.032258064, %v2172_v0  ;;  %v2169_v24 = vpop.xlane.xlu0 %2168 }
 0xcb5   :  { %v2173_v59 = vmul.f32 0.032258064, %v2169_v24 }
 0xcb6   :  { %4772 = vrsqrt.f32 %v2174_v23  ;;  %vm2184_vm8 = vcmp.eq.f32.partialorder %v2174_v23, inf  ;;  %v2187_v17 = vand.u32 2147483648, %v2174_v23  ;;  %vm2186_vm10 = vcmp.eq.f32.partialorder %v2174_v23, 0.0 }
 0xcb7   :  { %4774 = vrsqrt.f32 %v2173_v59  ;;  %vm2177_vm14 = vcmp.eq.f32.partialorder %v2173_v59, inf  ;;  %v2180_v29 = vand.u32 2147483648, %v2173_v59  ;;  %vm2179_vm2 = vcmp.eq.f32.partialorder %v2173_v59, 0.0 }
 0xcc0   :  { %v4773_v26 = vpop.eup %4772 }
 0xcc1   :  { %v4775_v27 = vpop.eup %4774  ;;  %v2183_v3 = vmul.f32 %v4773_v26, %v2174_v23 }
 0xcc2   :  { %v2176_v16 = vmul.f32 %v4775_v27, %v2173_v59 }
 0xcc3   :  { %v2185_v28 = vsel %vm2184_vm8, %v2174_v23, %v2183_v3 }
 0xcc4   :  { %v2188_v30 = vsel %vm2186_vm10, %v2187_v17, %v2185_v28  ;;  %v2178_v31 = vsel %vm2177_vm14, %v2173_v59, %v2176_v16 }
 0xcc5   :  { %v2190_v35 = vadd.f32 1e-06, %v2188_v30  ;;  %v2181_v36 = vsel %vm2179_vm2, %v2180_v29, %v2178_v31 }
 0xcc6   :  { %v2189_v38 = vadd.f32 1e-06, %v2181_v36 }
 0xcc7   :  { %4776 = vrcp.f32 %v2190_v35 }
 0xcc8   :  { %4778 = vrcp.f32 %v2189_v38 }
 0xcd1   :  { %v4777_v39 = vpop.eup %4776 }
 0xcd2   :  { %v4779_v42 = vpop.eup %4778  ;;  %v2194_v43 = vmul.f32 %v4777_v39, %v2164_v13 }
 0xcd3   :  { %v2192_v10 = vmul.f32 %v4779_v42, %v2163_v33 }
 0xcd4   :  { %v2202_v9 = vmul.f32 %v4104_v40, %v2194_v43 }
 0xcd5   :  { %v2201_v37 = vmul.f32 %v4104_v40, %v2192_v10 }
 0xcd6   :  { %v2210_v45 = vadd.f32 %v4105_v63, %v2202_v9 }
 0xcd7   :  { %v2209_v44 = vadd.f32 %v4105_v63, %v2201_v37 }
 0xcd9   :  { %4449 = vmatprep.mubr.msk.f32.mxu0 %vm195_vm1, %v2209_v44 }
 0xcda   :  { %4450 = vmatmul.mubr.msk.f32.vlgmr.msra.gmra.mrb[26].mxu0 %vm195_vm1, %v2210_v45 }
 0xcdb   :  { %4454 = vmatprep.mubr.msk.f32.mxu0 %vm4829_vm6, %v4828_v55 }
 0xdad   :  { %v4451_v22 = vpop.f32.mrb[26].mxu0 }
 0xdae   :  { %v2299_v48 = vpop.f32.mrb[27].mxu0  ;;  %v5475_v53 = vadd.f32 %v4451_v22, %v4106_v47 }
 0xdaf   :  { %v5469_v49 = vadd.f32 %v4106_v47, %v2299_v48 }
 0xdb1   :  { %2311 = vrot.lane.b32.xlu1 %v5469_v49, %s4830_s30  ;;  %2309 = vrot.lane.b32.xlu0 %v5469_v49, %s4831_s4 }
 0xdb5   :  { %2313 = vrot.lane.b32.xlu1 %v5469_v49, %s4832_s5  ;;  %2318 = vrot.lane.b32.xlu0 %v5475_v53, %s4830_s30 }
 0xdb9   :  { %2316 = vrot.lane.b32.xlu1 %v5475_v53, %s4831_s4  ;;  %2322 = vrot.lane.b32.xlu0 %v5469_v49, %s4833_s12 }
 0xdbd   :  { %2320 = vrot.lane.b32.xlu1 %v5475_v53, %s4832_s5 }
 0xe23   :  { %v5487_v46 = vpop.permute.xlu1 %2311  ;;  %v5489_v58 = vpop.permute.xlu0 %2309 }
 0xe24   :  { %2474 = vrot.lane.b32.xlu0 %v5487_v46, %s4833_s12  ;;  %2398 = vrot.lane.b32.xlu1 %v5489_v58, %s4833_s12 }
 0xe27   :  { %v5495_v2 = vpop.permute.xlu1 %2313  ;;  %v5497_v56 = vpop.permute.xlu0 %2318 }
 0xe28   :  { %2626 = vrot.lane.b32.xlu0 %v5475_v53, %s4833_s12  ;;  %2550 = vrot.lane.b32.xlu1 %v5495_v2, %s4833_s12 }
 0xe2b   :  { %v5503_v54 = vpop.permute.xlu1 %2316  ;;  %v2323_v5 = vpop.permute.xlu0 %2322 }
 0xe2c   :  { %2702 = vrot.lane.b32.xlu1 %v5503_v54, %s4833_s12  ;;  %2778 = vrot.lane.b32.xlu0 %v5497_v56, %s4833_s12 }
 0xe2d   :  { %4453 = vmatpush3.xpose.msk.msra.mxu0 %vm366_vm7, %v2323_v5 }
 0xe2e   :  { %4457 = vmatprep.subr.mxu0 %v4828_v55 }
 0xe2f   :  { %v5511_v7 = vpop.permute.xlu1 %2320 }
 0xe30   :  { %4455 = vmatmul.mubr.msk.f32.vlgmr.msra.gmra.mrb[28].mxu0 %vm366_vm7, %v5469_v49  ;;  %2854 = vrot.lane.b32.xlu1 %v5511_v7, %s4833_s12 }
 0xe31   :  { %4459 = vmatprep.mubr.msk.f32.mxu0 %vm4829_vm6, %v4828_v55 }
 0xe96   :  { %v2399_v8 = vpop.permute.xlu1 %2398  ;;  %v2475_v11 = vpop.permute.xlu0 %2474 }
 0xe97   :  { %4458 = vmatpush3.xpose.msk.msra.mxu0 %vm366_vm7, %v2399_v8 }
 0xe98   :  { %4462 = vmatprep.subr.mxu0 %v4828_v55 }
 0xe9a   :  { %4460 = vmatmul.mubr.msk.f32.vlgmr.msra.gmra.mrb[30].mxu0 %vm366_vm7, %v5489_v58  ;;  %v2627_v12 = vpop.permute.xlu0 %2626  ;;  %v2551_v13 = vpop.permute.xlu1 %2550 }
 0xe9b   :  { %4463 = vmatpush3.xpose.msk.msra.mxu0 %vm366_vm7, %v2475_v11  ;;  %4464 = vmatprep.mubr.msk.f32.mxu0 %vm4829_vm6, %v4828_v55 }
 0xe9c   :  { %4467 = vmatprep.subr.mxu0 %v4828_v55 }
 0xe9e   :  { %4465 = vmatmul.mubr.msk.f32.vlgmr.msra.gmra.mrb[32].mxu0 %vm366_vm7, %v5487_v46  ;;  %v2779_v33 = vpop.permute.xlu0 %2778  ;;  %v2703_v1 = vpop.permute.xlu1 %2702 }
 0xe9f   :  { %4468 = vmatpush3.xpose.msk.msra.mxu0 %vm366_vm7, %v2551_v13  ;;  %4483 = vmatpush3.xpose.msk.msra.mxu1 %vm366_vm7, %v2779_v33 }
 0xea0   :  { %4469 = vmatprep.mubr.msk.f32.mxu0 %vm4829_vm6, %v4828_v55  ;;  %4472 = vmatprep.subr.mxu0 %v4828_v55 }
 0xea1   :  { %4492 = vmatprep.subr.mxu1 %v4828_v55 }
 0xea2   :  { %4470 = vmatmul.mubr.msk.f32.vlgmr.msra.gmra.mrb[34].mxu0 %vm366_vm7, %v5495_v2  ;;  %4485 = vmatmul.mubr.msk.f32.vlgmr.msra.gmra.mrb[16].mxu1 %vm366_vm7, %v5497_v56  ;;  %v2855_v14 = vpop.permute.xlu1 %2854 }
 0xea3   :  { %4473 = vmatpush3.xpose.msk.msra.mxu0 %vm366_vm7, %v2627_v12  ;;  %4474 = vmatprep.mubr.msk.f32.mxu0 %vm4829_vm6, %v4828_v55 }
 0xea4   :  { %4477 = vmatprep.subr.mxu0 %v4828_v55  ;;  %4494 = vmatprep.mubr.msk.f32.mxu1 %vm4829_vm6, %v4828_v55 }
 0xea6   :  { %4475 = vmatmul.mubr.msk.f32.vlgmr.msra.gmra.mrb[36].mxu0 %vm366_vm7, %v5475_v53 }
 0xea7   :  { %4478 = vmatpush3.xpose.msk.msra.mxu0 %vm366_vm7, %v2703_v1  ;;  %4479 = vmatprep.mubr.msk.f32.mxu0 %vm4829_vm6, %v4828_v55 }
 0xea8   :  { %4487 = vmatprep.subr.mxu0 %v4828_v55 }
 0xeaa   :  { %4480 = vmatmul.mubr.msk.f32.vlgmr.msra.gmra.mrb[38].mxu0 %vm366_vm7, %v5503_v54 }
 0xeab   :  { %4488 = vmatpush3.xpose.msk.msra.mxu0 %vm366_vm7, %v2855_v14  ;;  %4489 = vmatprep.mubr.msk.f32.mxu0 %vm4829_vm6, %v4828_v55 }
 0xeac   :  { %4497 = vmatprep.subr.mxu0 %v4828_v55 }
 0xeae   :  { %4490 = vmatmul.mubr.msk.f32.vlgmr.msra.gmra.mrb[40].mxu0 %vm366_vm7, %v5511_v7 }
 0xeaf   :  { %4499 = vmatprep.mubr.msk.f32.mxu0 %vm4829_vm6, %v4828_v55 }
 0xf03   :  { %v2394_v34 = vpop.f32.mrb[28].mxu0 }
 0xf04   :  { %v2930_v57 = vsel %vm5144_vm9, -1e+09, %v2394_v34  ;;  %v4456_v15 = vpop.f32.mrb[29].mxu0 }
 0xf05   :  { %v2938_v18 = vsel %vm366_vm7, %v2930_v57, -inf }
 0xf06   :  { %2939 = vmax.xlane.f32.xlu0 %v2938_v18 }
 0xf6d   :  { %v2470_v19 = vpop.f32.mrb[30].mxu0 }
 0xf6e   :  { %v2931_v21 = vsel %vm5169_vm13, -1e+09, %v2470_v19  ;;  %v4461_v60 = vpop.f32.mrb[31].mxu0 }
 0xf6f   :  { %v2941_v62 = vsel %vm366_vm7, %v2931_v21, -inf }
 0xf70   :  { %2942 = vmax.xlane.f32.xlu1 %v2941_v62 }
 0xf71   :  { %v2546_v0 = vpop.f32.mrb[32].mxu0 }
 0xf72   :  { %v2932_v23 = vsel %vm5182_vm15, -1e+09, %v2546_v0  ;;  %v4466_v24 = vpop.f32.mrb[33].mxu0 }
 0xf73   :  { %v2944_v20 = vsel %vm366_vm7, %v2932_v23, -inf }
 0xf74   :  { %2945 = vmax.xlane.f32.xlu0 %v2944_v20 }
 0xf75   :  { %v2622_v59 = vpop.f32.mrb[34].mxu0  ;;  %v2850_v26 = vpop.f32.mrb[16].mxu1 }
 0xf76   :  { %v2933_v27 = vsel %vm5195_vm3, -1e+09, %v2622_v59  ;;  %v4471_v3 = vpop.f32.mrb[35].mxu0  ;;  %v4486_v32 = vpop.f32.mrb[17].mxu1  ;;  %v2936_v30 = vsel %vm5212_vm5, -1e+09, %v2850_v26 }
 0xf77   :  { %v2947_v17 = vsel %vm366_vm7, %v2933_v27, -inf  ;;  %v2956_v38 = vsel %vm366_vm7, %v2936_v30, -inf }
 0xf78   :  { %2948 = vmax.xlane.f32.xlu0 %v2947_v17 }
 0xf79   :  { %v2698_v16 = vpop.f32.mrb[36].mxu0 }
 0xf7a   :  { %v2934_v28 = vsel %vm5199_vm4, -1e+09, %v2698_v16  ;;  %v4476_v41 = vpop.f32.mrb[37].mxu0  ;;  %vm4053_vm4 = vcmask 7168  }
 0xf7b   :  { %v2950_v29 = vsel %vm366_vm7, %v2934_v28, -inf }
 0xf7c   :  { %2951 = vmax.xlane.f32.xlu0 %v2950_v29 }
 0xf7d   :  { %v2774_v31 = vpop.f32.mrb[38].mxu0 }
 0xf7e   :  { %v2935_v51 = vsel %vm5235_vm11, -1e+09, %v2774_v31  ;;  %v4481_v35 = vpop.f32.mrb[39].mxu0 }
 0xf7f   :  { %v2953_v36 = vsel %vm366_vm7, %v2935_v51, -inf }
 0xf80   :  { %2954 = vmax.xlane.f32.xlu1 %v2953_v36  ;;  %2957 = vmax.xlane.f32.xlu0 %v2956_v38 }
 0xf81   :  { %v2926_v52 = vpop.f32.mrb[40].mxu0 }
 0xf82   :  { %v2937_v39 = vsel %vm5242_vm12, -1e+09, %v2926_v52  ;;  %v4491_v40 = vpop.f32.mrb[41].mxu0 }
 0xf83   :  { %v2959_v6 = vsel %vm366_vm7, %v2937_v39, -inf }
 0xf84   :  { %2960 = vmax.xlane.f32.xlu1 %v2959_v6 }
 0xf93   :  { %v2940_v61 = vpop.xlane.xlu0 %2939 }
 0xf94   :  { %v2962_v25 = vsub.f32 %v2930_v57, %v2940_v61 }
 0xf95   :  { %3102 = vrot.lane.b32.xlu1 %v5489_v58, %s5845_s17 }
 0xf96   :  { %3026 = vrot.lane.b32.xlu0 %v5469_v49, %s5845_s17  ;;  %v2970_v42 = vmul.f32 1.442695, %v2962_v25 }
 0xf98   :  { %4780 = vpow2.f32 %v2970_v42 }
 0xf99   :  { %3178 = vrot.lane.b32.xlu1 %v5487_v46, %s5845_s17 }
 0xf9a   :  { %3330 = vrot.lane.b32.xlu0 %v5475_v53, %s5845_s17 }
 0xf9d   :  { %3254 = vrot.lane.b32.xlu1 %v5495_v2, %s5845_s17 }
 0xfa1   :  { %3406 = vrot.lane.b32.xlu1 %v5503_v54, %s5845_s17 }
 0xfa2   :  { %v5597_v43 = vpop.eup %4780 }
 0xfa3   :  { %v2986_v10 = vsel %vm366_vm7, %v5597_v43, 0.0 }
 0xfb9   :  { %2987 = vadd.xlane.f32.xlu0 %v2986_v10 }
 0xffd   :  { %v2943_v63 = vpop.xlane.xlu1 %2942 }
 0xffe   :  { %v2963_v9 = vsub.f32 %v2931_v21, %v2943_v63 }
0x1000   :  { %v2972_v37 = vmul.f32 1.442695, %v2963_v9 }
0x1001   :  { %v2946_v44 = vpop.xlane.xlu0 %2945 }
0x1002   :  { %4782 = vpow2.f32 %v2972_v37  ;;  %v2964_v53 = vsub.f32 %v2932_v23, %v2946_v44 }
0x1004   :  { %v2974_v12 = vmul.f32 1.442695, %v2964_v53 }
0x1005   :  { %v2949_v45 = vpop.xlane.xlu0 %2948 }
0x1006   :  { %v2965_v47 = vsub.f32 %v2933_v27, %v2949_v45 }
0x1008   :  { %v2976_v22 = vmul.f32 1.442695, %v2965_v47 }
0x1009   :  { %v2952_v48 = vpop.xlane.xlu0 %2951 }
0x100a   :  { %4784 = vpow2.f32 %v2976_v22  ;;  %v2966_v13 = vsub.f32 %v2934_v28, %v2952_v48 }
0x100c   :  { %v5601_v49 = vpop.eup %4782  ;;  %v2978_v15 = vmul.f32 1.442695, %v2966_v13 }
0x100d   :  { %v2955_v46 = vpop.xlane.xlu1 %2954  ;;  %v2958_v58 = vpop.xlane.xlu0 %2957  ;;  %v2989_v2 = vsel %vm366_vm7, %v5601_v49, 0.0 }
0x100e   :  { %v2967_v54 = vsub.f32 %v2935_v51, %v2955_v46  ;;  %v2968_v5 = vsub.f32 %v2936_v30, %v2958_v58  ;;  %2990 = vadd.xlane.f32.xlu1 %v2989_v2  ;;  %v2216_v2 = vld [vmem:[%s5782_s22] sm:$0xff] }
0x1010   :  { %v2980_v8 = vmul.f32 1.442695, %v2967_v54  ;;  %v2982_v11 = vmul.f32 1.442695, %v2968_v5  ;;  %v2218_v5 = vld [vmem:[%s5782_s22 + $0x10] sm:$0xff] }
0x1011   :  { %v2961_v33 = vpop.xlane.xlu1 %2960  ;;  %v3027_v1 = vpop.permute.xlu0 %3026 }
0x1012   :  { %4786 = vpow2.f32 %v2980_v8  ;;  %v2969_v14 = vsub.f32 %v2937_v39, %v2961_v33  ;;  %4493 = vmatpush3.msra.mxu1 %v3027_v1  ;;  %v2219_v8 = vld [vmem:[%s5782_s22 + $0x18] sm:$0xff] }
0x1013   :  { %4788 = vpow2.f32 %v2982_v11  ;;  %4502 = vmatprep.subr.mxu1 %v4828_v55  ;;  %v4661_v11 = vpack.c.bf16 %v2219_v8, %v2218_v5 }
0x1014   :  { %v4785_v34 = vpop.eup %4784  ;;  %v2984_v57 = vmul.f32 1.442695, %v2969_v14  ;;  %4790 = vpow2.f32 %v2974_v12 }
0x1015   :  { %v3103_v18 = vpop.permute.xlu1 %3102  ;;  %v2995_v19 = vsel %vm366_vm7, %v4785_v34, 0.0  ;;  %v3331_v3 = vpop.permute.xlu0 %3330 }
0x1016   :  { %4792 = vpow2.f32 %v2984_v57  ;;  %4498 = vmatpush3.msra.mxu0 %v3103_v18  ;;  %2996 = vadd.xlane.f32.xlu1 %v2995_v19 }
0x1017   :  { %4507 = vmatprep.subr.mxu0 %v4828_v55  ;;  %4794 = vpow2.f32 %v2978_v15 }
0x1019   :  { %v3179_v28 = vpop.permute.xlu1 %3178 }
0x101c   :  { %v4787_v21 = vpop.eup %4786 }
0x101d   :  { %v5608_v60 = vpop.eup %4788  ;;  %v3001_v62 = vsel %vm366_vm7, %v4787_v21, 0.0  ;;  %v3255_v41 = vpop.permute.xlu1 %3254 }
0x101e   :  { %3002 = vadd.xlane.f32.xlu1 %v3001_v62  ;;  %v3004_v0 = vsel %vm366_vm7, %v5608_v60, 0.0  ;;  %v4791_v23 = vpop.eup %4790 }
0x101f   :  { %3005 = vadd.xlane.f32.xlu0 %v3004_v0  ;;  %v2992_v59 = vsel %vm366_vm7, %v4791_v23, 0.0 }
0x1020   :  { %v4793_v24 = vpop.eup %4792 }
0x1021   :  { %v3007_v20 = vsel %vm366_vm7, %v4793_v24, 0.0  ;;  %v4795_v26 = vpop.eup %4794 }
0x1022   :  { %3008 = vadd.xlane.f32.xlu1 %v3007_v20  ;;  %v2998_v27 = vsel %vm366_vm7, %v4795_v26, 0.0 }
0x1023   :  { %2993 = vadd.xlane.f32.xlu0 %v2992_v59 }
0x1027   :  { %2999 = vadd.xlane.f32.xlu0 %v2998_v27 }
0x1033   :  { %3558 = vrot.lane.b32.xlu1 %v5511_v7, %s5845_s17  ;;  %v3407_v7 = vpop.permute.xlu1 %3406 }
0x103d   :  { %3482 = vrot.lane.b32.xlu0 %v5497_v56, %s5845_s17 }
0x1046   :  { %v2988_v32 = vpop.xlane.xlu0 %2987 }
0x1047   :  { %4796 = vrcp.f32 %v2988_v32 }
0x1051   :  { %v4797_v17 = vpop.eup %4796 }
0x1052   :  { %v3018_v16 = vmul.f32 %v4797_v17, %v5597_v43  ;;  %v4133_v17 = vld [vmem:[%s5783_s23] ss:$0 sm:$0xff] }
0x1054   :  { %4495 = vmatmul.mubr.msk.f32.vlgmr.msra.gmra.mrb[18].mxu1 %vm366_vm7, %v3018_v16 }
0x1055   :  { %4503 = vmatpush3.msra.mxu1 %v3179_v28  ;;  %4504 = vmatprep.mubr.msk.f32.mxu1 %vm4829_vm6, %v4828_v55 }
0x1056   :  { %4512 = vmatprep.subr.mxu1 %v4828_v55 }
0x109b   :  { %v2991_v29 = vpop.xlane.xlu1 %2990 }
0x109c   :  { %4798 = vrcp.f32 %v2991_v29 }
0x10a3   :  { %v2997_v56 = vpop.xlane.xlu1 %2996 }
0x10a4   :  { %4800 = vrcp.f32 %v2997_v56 }
0x10a6   :  { %v4799_v30 = vpop.eup %4798 }
0x10a7   :  { %v3019_v31 = vmul.f32 %v4799_v30, %v5601_v49 }
0x10a9   :  { %4500 = vmatmul.mubr.msk.f32.vlgmr.msra.gmra.mrb[42].mxu0 %vm366_vm7, %v3019_v31 }
0x10aa   :  { %4508 = vmatpush3.msra.mxu0 %v3255_v41  ;;  %4509 = vmatprep.mubr.msk.f32.mxu0 %vm4829_vm6, %v4828_v55 }
0x10ab   :  { %v3003_v51 = vpop.xlane.xlu1 %3002  ;;  %4517 = vmatprep.subr.mxu0 %v4828_v55 }
0x10ac   :  { %4802 = vrcp.f32 %v3003_v51  ;;  %v3006_v35 = vpop.xlane.xlu0 %3005 }
0x10ae   :  { %v4801_v36 = vpop.eup %4800 }
0x10af   :  { %v3021_v38 = vmul.f32 %v4801_v36, %v4785_v34  ;;  %v3009_v52 = vpop.xlane.xlu1 %3008 }
0x10b0   :  { %4804 = vrcp.f32 %v3009_v52  ;;  %v2994_v39 = vpop.xlane.xlu0 %2993 }
0x10b1   :  { %4806 = vrcp.f32 %v2994_v39  ;;  %4510 = vmatmul.mubr.msk.f32.vlgmr.msra.gmra.mrb[44].mxu0 %vm366_vm7, %v3021_v38 }
0x10b2   :  { %4518 = vmatpush3.msra.mxu0 %v3407_v7  ;;  %4519 = vmatprep.mubr.msk.f32.mxu0 %vm4829_vm6, %v4828_v55 }
0x10b3   :  { %4527 = vmatprep.subr.mxu0 %v4828_v55  ;;  %v3559_v25 = vpop.permute.xlu1 %3558 }
0x10b4   :  { %v3000_v40 = vpop.xlane.xlu0 %2999 }
0x10b5   :  { %4808 = vrcp.f32 %v3000_v40 }
0x10b6   :  { %v4803_v6 = vpop.eup %4802  ;;  %4810 = vrcp.f32 %v3006_v35 }
0x10b7   :  { %v3023_v61 = vmul.f32 %v4803_v6, %v4787_v21 }
0x10b8   :  { %v3483_v45 = vpop.permute.xlu0 %3482 }
0x10b9   :  { %4520 = vmatmul.mubr.msk.f32.vlgmr.msra.gmra.mrb[46].mxu0 %vm366_vm7, %v3023_v61 }
0x10ba   :  { %v4805_v42 = vpop.eup %4804  ;;  %4528 = vmatpush3.msra.mxu0 %v3559_v25  ;;  %4529 = vmatprep.mubr.msk.f32.mxu0 %vm4829_vm6, %v4828_v55  ;;  %v3810_v25 = vld [vmem:[%s5784_s24 + $0x8] sm:$0xff] }
0x10bb   :  { %v4807_v43 = vpop.eup %4806  ;;  %v3025_v10 = vmul.f32 %v4805_v42, %v4793_v24  ;;  %v3811_v42 = vld [vmem:[%s5784_s24 + $0x10] sm:$0xff] }
0x10bc   :  { %v3020_v63 = vmul.f32 %v4807_v43, %v4791_v23 }
0x10bd   :  { %4530 = vmatmul.mubr.msk.f32.vlgmr.msra.gmra.mrb[48].mxu0 %vm366_vm7, %v3025_v10  ;;  %v3812_v10 = vld [vmem:[%s5784_s24 + $0x18] sm:$0xff] }
0x10be   :  { %4505 = vmatmul.mubr.msk.f32.vlgmr.msra.gmra.mrb[20].mxu1 %vm366_vm7, %v3020_v63  ;;  %v4669_v63 = vpack.c.bf16 %v3812_v10, %v3811_v42 }
0x10bf   :  { %v4809_v9 = vpop.eup %4808  ;;  %4513 = vmatpush3.msra.mxu1 %v3331_v3  ;;  %4514 = vmatprep.mubr.msk.f32.mxu1 %vm4829_vm6, %v4828_v55 }
0x10c0   :  { %v3022_v37 = vmul.f32 %v4809_v9, %v4795_v26  ;;  %4522 = vmatprep.subr.mxu1 %v4828_v55  ;;  %v4811_v44 = vpop.eup %4810 }
0x10c1   :  { %v3024_v47 = vmul.f32 %v4811_v44, %v5608_v60 }
0x10c2   :  { %4515 = vmatmul.mubr.msk.f32.vlgmr.msra.gmra.mrb[22].mxu1 %vm366_vm7, %v3022_v37 }
0x10c3   :  { %4523 = vmatpush3.msra.mxu1 %v3483_v45  ;;  %4524 = vmatprep.mubr.msk.f32.mxu1 %vm4829_vm6, %v4828_v55  ;;  %v2217_v55 = vld [vmem:[%s5782_s22 + $0x8] sm:$0xff]  ;;  %vm5847_vm6 = vcmask 195584  }
0x10c4   :  { %v4657_v54 = vpack.c.bf16 %v2217_v55, %v2216_v2  ;;  %vm5848_vm9 = vmmov %vm5847_vm6 }
0x10c6   :  { %4525 = vmatmul.mubr.msk.f32.vlgmr.msra.gmra.mrb[24].mxu1 %vm366_vm7, %v3024_v47  ;;  %4658 = vmatprep.subr.bf16.mxu1 %v4657_v54 }
0x10c7   :  { %4660 = vmatpush3.bf16.msra.mxu1 %v4657_v54 }
0x10c8   :  { %4662 = vmatprep.subr.bf16.mxu1 %v4661_v11 }
0x10cb   :  { %4664 = vmatpush3.bf16.msra.mxu1 %v4661_v11 }
0x1127   :  { %v3098_v22 = vpop.f32.mrb[18].mxu1 }
0x1128   :  { %v4496_v48 = vpop.f32.mrb[19].mxu1 }
0x117c   :  { %v3174_v49 = vpop.f32.mrb[42].mxu0 }
0x117d   :  { %v4501_v53 = vpop.f32.mrb[43].mxu0  ;;  %3635 = vrot.lane.b32.xlu0 %v3174_v49, %s4836_s29 }
0x1184   :  { %v3326_v46 = vpop.f32.mrb[44].mxu0 }
0x1185   :  { %v4511_v58 = vpop.f32.mrb[45].mxu0 }
0x118c   :  { %v3478_v12 = vpop.f32.mrb[46].mxu0 }
0x118d   :  { %v4521_v13 = vpop.f32.mrb[47].mxu0  ;;  %3650 = vrot.lane.b32.xlu0 %v3478_v12, %s4836_s29  ;;  %v4136_v12 = vld [vmem:[%s5785_s18] ss:$0 sm:$0xff] }
0x1190   :  { %v3630_v33 = vpop.f32.mrb[48].mxu0 }
0x1191   :  { %v3250_v1 = vpop.f32.mrb[20].mxu1  ;;  %v4531_v14 = vpop.f32.mrb[49].mxu0 }
0x1192   :  { %3639 = vrot.lane.b32.xlu1 %v3250_v1, %s4837_s7  ;;  %v4506_v34 = vpop.f32.mrb[21].mxu1 }
0x1195   :  { %v3402_v57 = vpop.f32.mrb[22].mxu1 }
0x1196   :  { %3643 = vrot.lane.b32.xlu1 %v3326_v46, %s5846_s1  ;;  %v4516_v15 = vpop.f32.mrb[23].mxu1 }
0x1199   :  { %v3554_v18 = vpop.f32.mrb[24].mxu1 }
0x119a   :  { %3658 = vrot.lane.b32.xlu1 %v3630_v33, %s5846_s1  ;;  %3654 = vrot.lane.b32.xlu0 %v3554_v18, %s4837_s7  ;;  %v4526_v19 = vpop.f32.mrb[25].mxu1  ;;  %v4137_v33 = vld [vmem:[%s5786_s19] ss:$0 sm:$0xff] }
0x119b   :  { %v3955_v19 = vld [vmem:[%s5787_s26] sm:$0xff] }
0x11ef   :  { %v3636_v21 = vpop.permute.xlu0 %3635 }
0x11f0   :  { %v3646_v62 = vsel %vm366_vm7, %v3098_v22, %v3636_v21  ;;  %v3956_v21 = vld [vmem:[%s5787_s26 + $0x8] sm:$0xff] }
0x11ff   :  { %v3651_v0 = vpop.permute.xlu0 %3650 }
0x1200   :  { %v3661_v59 = vsel %vm366_vm7, %v3402_v57, %v3651_v0  ;;  %v3958_v0 = vld [vmem:[%s5787_s26 + $0x18] sm:$0xff] }
0x1204   :  { %v3640_v60 = vpop.permute.xlu1 %3639 }
0x1205   :  { %v3647_v23 = vsel %vm113_vm0, %v3646_v62, %v3640_v60  ;;  %v4673_v60 = vpack.c.bf16 %v3956_v21, %v3955_v19  ;;  %v3957_v62 = vld [vmem:[%s5787_s26 + $0x10] sm:$0xff] }
0x1207   :  { %4674 = vmatprep.subr.bf16.mxu1 %v4673_v60 }
0x1208   :  { %v3644_v24 = vpop.permute.xlu1 %3643 }
0x1209   :  { %v3648_v20 = vsel %vm5847_vm6, %v3647_v23, %v3644_v24  ;;  %v4677_v23 = vpack.c.bf16 %v3958_v0, %v3957_v62  ;;  %v3959_v24 = vld [vmem:[%s5787_s26 + $0x20] sm:$0xff] }
0x120a   :  { %4540 = vmatprep.mubr.msk.f32.mxu1 %vm195_vm1, %v3648_v20  ;;  %v3960_v20 = vld [vmem:[%s5787_s26 + $0x28] sm:$0xff] }
0x120c   :  { %v3659_v26 = vpop.permute.xlu1 %3658  ;;  %v3655_v27 = vpop.permute.xlu0 %3654 }
0x120d   :  { %v3662_v3 = vsel %vm113_vm0, %v3661_v59, %v3655_v27  ;;  %v4681_v59 = vpack.c.bf16 %v3960_v20, %v3959_v24  ;;  %v3962_v27 = vld [vmem:[%s5787_s26 + $0x38] sm:$0xff] }
0x120e   :  { %v3663_v32 = vsel %vm5848_vm9, %v3662_v3, %v3659_v26  ;;  %v3961_v26 = vld [vmem:[%s5787_s26 + $0x30] sm:$0xff] }
0x120f   :  { %4541 = vmatmul.mubr.msk.f32.vlgmr.msra.gmra.mrb[26].mxu1 %vm195_vm1, %v3663_v32  ;;  %v4685_v3 = vpack.c.bf16 %v3962_v27, %v3961_v26  ;;  %v3963_v32 = vld [vmem:[%s5787_s26 + $0x40] sm:$0xff] }
0x1210   :  { %4676 = vmatpush3.bf16.msra.mxu1 %v4673_v60 }
0x1211   :  { %4678 = vmatprep.subr.bf16.mxu1 %v4677_v23 }
0x1214   :  { %4680 = vmatpush3.bf16.msra.mxu1 %v4677_v23 }
0x1215   :  { %4682 = vmatprep.subr.bf16.mxu1 %v4681_v59 }
0x1218   :  { %4684 = vmatpush3.bf16.msra.mxu1 %v4681_v59 }
0x1219   :  { %4686 = vmatprep.subr.bf16.mxu1 %v4685_v3 }
0x121c   :  { %4688 = vmatpush3.bf16.msra.mxu1 %v4685_v3 }
0x12e2   :  { %v4542_v16 = vpop.f32.mrb[26].mxu1 }
0x12e3   :  { %v3748_v28 = vadd.f32 %v4542_v16, %v4133_v17  ;;  %v3742_v41 = vpop.f32.mrb[27].mxu1 }
0x12e4   :  { %v3743_v7 = vadd.f32 %v4133_v17, %v3742_v41  ;;  %v3964_v17 = vld [vmem:[%s5787_s26 + $0x48] sm:$0xff]  ;;  %v3966_v41 = vld [vmem:[%s5787_s26 + $0x58] sm:$0xff] }
0x12e5   :  { %v3752_v29 = vadd.f32 %v3748_v28, %v5430_v4  ;;  %v4689_v16 = vpack.c.bf16 %v3964_v17, %v3963_v32  ;;  %v3965_v28 = vld [vmem:[%s5787_s26 + $0x50] sm:$0xff] }
0x12e6   :  { %v3751_v56 = vadd.f32 %v3743_v7, %v5433_v50  ;;  %v3809_v50 = vld [vmem:[%s5784_s24] sm:$0xff]  ;;  %v4693_v7 = vpack.c.bf16 %v3966_v41, %v3965_v28 }
0x12e7   :  { %v3756_v30 = vsel %vm195_vm1, %v3752_v29, 0.0  ;;  %v4665_v43 = vpack.c.bf16 %v3810_v25, %v3809_v50  ;;  %4690 = vmatprep.subr.bf16.mxu1 %v4689_v16 }
0x12e8   :  { %3757 = vadd.xlane.f32.xlu1 %v3756_v30  ;;  %v3753_v31 = vsel %vm195_vm1, %v3751_v56, 0.0  ;;  %4692 = vmatpush3.bf16.msra.mxu1 %v4689_v16 }
0x12e9   :  { %3754 = vadd.xlane.f32.xlu0 %v3753_v31  ;;  %4666 = vmatprep.subr.bf16.mxu0 %v4665_v43  ;;  %v3969_v31 = vld [vmem:[%s5787_s26 + $0x70] sm:$0xff] }
0x12ea   :  { %4668 = vmatpush3.bf16.msra.mxu0 %v4665_v43  ;;  %4694 = vmatprep.subr.bf16.mxu1 %v4693_v7 }
0x12eb   :  { %4670 = vmatprep.subr.bf16.mxu0 %v4669_v63 }
0x12ec   :  { %4696 = vmatpush3.bf16.msra.mxu1 %v4693_v7 }
0x12ee   :  { %4672 = vmatpush3.bf16.msra.mxu0 %v4669_v63 }
0x1375   :  { %v3758_v51 = vpop.xlane.xlu1 %3757 }
0x1376   :  { %v3760_v35 = vmul.f32 0.03125, %v3758_v51  ;;  %v3755_v36 = vpop.xlane.xlu0 %3754  ;;  %v3970_v51 = vld [vmem:[%s5787_s26 + $0x78] sm:$0xff] }
0x1377   :  { %v3759_v38 = vmul.f32 0.03125, %v3755_v36  ;;  %v33_v36 = vstv %s5788_s27 }
0x1378   :  { %v3762_v52 = vsub.f32 %v3752_v29, %v3760_v35  ;;  %v3967_v29 = vld [vmem:[%s5787_s26 + $0x60] sm:$0xff]  ;;  %v4701_v35 = vpack.c.bf16 %v3970_v51, %v3969_v31  ;;  %34 = vst [vmem:[#allocation2] sm:$0x1] %v33_v36 }
0x1379   :  { %v3761_v39 = vsub.f32 %v3751_v56, %v3759_v38  ;;  %v3968_v56 = vld [vmem:[%s5787_s26 + $0x68] sm:$0xff]  ;;  %v4138_v38 = vld [vmem:[%s5789_s25] ss:$0 sm:$0xff] }
0x137a   :  { %v3764_v61 = vmul.f32 %v3762_v52, %v3762_v52  ;;  %v4697_v30 = vpack.c.bf16 %v3968_v56, %v3967_v29 }
0x137b   :  { %v3763_v40 = vmul.f32 %v3761_v39, %v3761_v39 }
0x137c   :  { %v3768_v4 = vsel %vm195_vm1, %v3764_v61, 0.0  ;;  %4698 = vmatprep.subr.bf16.mxu1 %v4697_v30 }
0x137d   :  { %v3765_v6 = vsel %vm195_vm1, %v3763_v40, 0.0  ;;  %4700 = vmatpush3.bf16.msra.mxu1 %v4697_v30 }
0x137e   :  { %3766 = vadd.xlane.f32.xlu0 %v3765_v6  ;;  %4702 = vmatprep.subr.bf16.mxu1 %v4701_v35 }
0x137f   :  { %v4145_v41 = vld [vmem:[#allocation2] ss:$0 sm:$0xff] }
0x1381   :  { %4704 = vmatpush3.bf16.msra.mxu1 %v4701_v35 }
0x1382   :  { %3769 = vadd.xlane.f32.xlu0 %v3768_v4 }
0x140b   :  { %v3767_v9 = vpop.xlane.xlu0 %3766 }
0x140c   :  { %v3771_v37 = vmul.f32 0.032258064, %v3767_v9 }
0x140e   :  { %4812 = vrsqrt.f32 %v3771_v37  ;;  %vm3775_vm0 = vcmp.eq.f32.partialorder %v3771_v37, inf  ;;  %v3778_v48 = vand.u32 2147483648, %v3771_v37  ;;  %vm3777_vm7 = vcmp.eq.f32.partialorder %v3771_v37, 0.0 }
0x140f   :  { %v3770_v44 = vpop.xlane.xlu0 %3769 }
0x1410   :  { %v3772_v45 = vmul.f32 0.032258064, %v3770_v44 }
0x1412   :  { %4814 = vrsqrt.f32 %v3772_v45  ;;  %vm3782_vm13 = vcmp.eq.f32.partialorder %v3772_v45, inf  ;;  %v3785_v55 = vand.u32 2147483648, %v3772_v45  ;;  %vm3784_vm15 = vcmp.eq.f32.partialorder %v3772_v45, 0.0 }
0x1418   :  { %v4813_v47 = vpop.eup %4812 }
0x1419   :  { %v3774_v22 = vmul.f32 %v4813_v47, %v3771_v37 }
0x141b   :  { %v3776_v49 = vsel %vm3775_vm0, %v3771_v37, %v3774_v22 }
0x141c   :  { %v4815_v53 = vpop.eup %4814  ;;  %v3779_v46 = vsel %vm3777_vm7, %v3778_v48, %v3776_v49 }
0x141d   :  { %v3787_v58 = vadd.f32 1e-06, %v3779_v46  ;;  %v3781_v2 = vmul.f32 %v4815_v53, %v3772_v45 }
0x141f   :  { %4816 = vrcp.f32 %v3787_v58  ;;  %v3783_v54 = vsel %vm3782_vm13, %v3772_v45, %v3781_v2 }
0x1420   :  { %v3786_v5 = vsel %vm3784_vm15, %v3785_v55, %v3783_v54 }
0x1421   :  { %v3788_v8 = vadd.f32 1e-06, %v3786_v5 }
0x1423   :  { %4818 = vrcp.f32 %v3788_v8 }
0x1429   :  { %v4817_v11 = vpop.eup %4816 }
0x142a   :  { %v3790_v13 = vmul.f32 %v4817_v11, %v3761_v39 }
0x142c   :  { %v3799_v1 = vmul.f32 %v4136_v12, %v3790_v13 }
0x142d   :  { %v4819_v14 = vpop.eup %4818 }
0x142e   :  { %v3792_v34 = vmul.f32 %v4819_v14, %v3762_v52  ;;  %v3807_v57 = vadd.f32 %v4137_v33, %v3799_v1 }
0x1430   :  { %v3800_v15 = vmul.f32 %v4136_v12, %v3792_v34  ;;  %4551 = vmatprep.mubr.msk.f32.mxu0 %vm195_vm1, %v3807_v57 }
0x1432   :  { %v3808_v18 = vadd.f32 %v4137_v33, %v3800_v15 }
0x1434   :  { %4552 = vmatmul.mubr.msk.f32.vlgmr.msra.gmra.mrb[50].mxu0 %vm195_vm1, %v3808_v18 }
0x1507   :  { %v4553_v52 = vpop.f32.mrb[50].mxu0 }
0x1508   :  { %v3898_v39 = vadd.f32 %v4553_v52, %v4138_v38  ;;  %v3892_v40 = vpop.f32.mrb[51].mxu0 }
0x1509   :  { %v3893_v6 = vadd.f32 %v4138_v38, %v3892_v40 }
0x150a   :  { %v3902_v61 = vmul.f32 0.70710677, %v3898_v39  ;;  %v3950_v17 = vmul.f32 0.5, %v3898_v39 }
0x150b   :  { %v3901_v4 = vmul.f32 0.70710677, %v3893_v6  ;;  %v3949_v3 = vmul.f32 0.5, %v3893_v6 }
0x150c   :  { %v3904_v50 = vand.u32 2147483647, %v3902_v61  ;;  %vm3944_vm1 = vcmp.ge.f32.partialorder %v3902_v61, 0.0 }
0x150d   :  { %v3903_v25 = vand.u32 2147483647, %v3901_v4  ;;  %vm3943_vm3 = vcmp.ge.f32.partialorder %v3901_v4, 0.0 }
0x150e   :  { %v3906_v42 = vmul.f32 0.3275911, %v3904_v50  ;;  %v3932_v9 = vsub.f32 0.0, %v3904_v50 }
0x150f   :  { %v3905_v43 = vmul.f32 0.3275911, %v3903_v25  ;;  %v3931_v37 = vsub.f32 0.0, %v3903_v25 }
0x1510   :  { %v3908_v10 = vadd.f32 1.0, %v3906_v42  ;;  %v3934_v45 = vmul.f32 %v3932_v9, %v3904_v50 }
0x1511   :  { %v3907_v63 = vadd.f32 1.0, %v3905_v43  ;;  %v3933_v48 = vmul.f32 %v3931_v37, %v3903_v25 }
0x1512   :  { %4820 = vrcp.f32 %v3908_v10  ;;  %v3937_v46 = vmul.f32 1.442695, %v3934_v45 }
0x1513   :  { %4822 = vrcp.f32 %v3907_v63  ;;  %v3935_v55 = vmul.f32 1.442695, %v3933_v48 }
0x1514   :  { %4824 = vpow2.f32 %v3937_v46 }
0x1515   :  { %4826 = vpow2.f32 %v3935_v55 }
0x151c   :  { %v4821_v44 = vpop.eup %4820 }
0x151d   :  { %v4823_v47 = vpop.eup %4822  ;;  %v3914_v22 = vmul.f32 1.0614054, %v4821_v44 }
0x151e   :  { %v3913_v49 = vmul.f32 1.0614054, %v4823_v47  ;;  %v4825_v18 = vpop.eup %4824 }
0x151f   :  { %v4142_v53 = vadd.f32 -1.4531521, %v3914_v22  ;;  %v4827_v21 = vpop.eup %4826 }
0x1520   :  { %v4141_v58 = vadd.f32 -1.4531521, %v3913_v49 }
0x1521   :  { %v3918_v2 = vmul.f32 %v4821_v44, %v4142_v53 }
0x1522   :  { %v3917_v54 = vmul.f32 %v4823_v47, %v4141_v58 }
0x1523   :  { %v3920_v5 = vadd.f32 1.4214138, %v3918_v2 }
0x1524   :  { %v3919_v8 = vadd.f32 1.4214138, %v3917_v54 }
0x1525   :  { %v3922_v11 = vmul.f32 %v4821_v44, %v3920_v5 }
0x1526   :  { %v3921_v12 = vmul.f32 %v4823_v47, %v3919_v8 }
0x1527   :  { %v4144_v13 = vadd.f32 -0.28449672, %v3922_v11 }
0x1528   :  { %v4143_v33 = vadd.f32 -0.28449672, %v3921_v12 }
0x1529   :  { %v3926_v1 = vmul.f32 %v4821_v44, %v4144_v13 }
0x152a   :  { %v3925_v14 = vmul.f32 %v4823_v47, %v4143_v33 }
0x152b   :  { %v3928_v34 = vadd.f32 0.2548296, %v3926_v1 }
0x152c   :  { %v3927_v57 = vadd.f32 0.2548296, %v3925_v14 }
0x152d   :  { %v3930_v15 = vmul.f32 %v4821_v44, %v3928_v34 }
0x152e   :  { %v3929_v19 = vmul.f32 %v4823_v47, %v3927_v57 }
0x152f   :  { %v3940_v60 = vmul.f32 %v4825_v18, %v3930_v15 }
0x1530   :  { %v3939_v62 = vmul.f32 %v4827_v21, %v3929_v19 }
0x1531   :  { %v3942_v0 = vsub.f32 1.0, %v3940_v60 }
0x1532   :  { %v3941_v23 = vsub.f32 1.0, %v3939_v62 }
0x1533   :  { %v3946_v24 = vsub.f32 0.0, %v3942_v0 }
0x1534   :  { %v3945_v20 = vsub.f32 0.0, %v3941_v23 }
0x1535   :  { %v3948_v59 = vsel %vm3944_vm1, %v3942_v0, %v3946_v24 }
0x1536   :  { %v3952_v26 = vadd.f32 1.0, %v3948_v59  ;;  %v3947_v27 = vsel %vm3943_vm3, %v3941_v23, %v3945_v20 }
0x1537   :  { %v3951_v32 = vadd.f32 1.0, %v3947_v27 }
0x1538   :  { %v3954_v28 = vmul.f32 %v3952_v26, %v3950_v17 }
0x1539   :  { %v3953_v16 = vmul.f32 %v3951_v32, %v3949_v3 }
0x153b   :  { %4586 = vmatprep.mubr.f32.mxu1 %v3953_v16 }
0x153c   :  { %4587 = vmatmul.mubr.f32.vlgmr.msra.gmra.mrb[28].mxu1 %v3954_v28 }
0x160f   :  { %v4588_v7 = vpop.f32.mrb[28].mxu1 }
0x1610   :  { %v4050_v29 = vadd.f32 %v4588_v7, %v4145_v41  ;;  %v4044_v56 = vpop.f32.mrb[29].mxu1 }
0x1611   :  { %v4045_v30 = vadd.f32 %v4145_v41, %v4044_v56 }
0x1612   :  { %4055 = vst.msk [vmem:[%s5790_s28 + $0x8] sm:$0xff] %vm4053_vm4, %v4050_v29 }
0x1613   :  { %4054 = vst.msk [vmem:[%s5790_s28] sm:$0xff] %vm4053_vm4, %v4045_v30 }

</bundles_post_ra>
